<compile_context>
chip_gen: v7x
topology: tpu7x:2x2x1
jax: 0.10.0
libtpu: 0.0.40
codegen_flags: <defaults>
</compile_context>

<pallas_src>
import functools
import math

import jax
import jax.numpy as jnp
from jax import lax
from jax.experimental import pallas as pl
from jax.experimental.pallas import tpu as pltpu

# Module hyper-parameters (defaults of OTCrossEntropyLoss / SinkhornDistance).
ALPHA = 0.3
EPS = 0.1
MAX_ITER = 100
STAB = 1e-6
TOL = 1e-4
CHECK_EVERY = 5          # divides MAX_ITER; convergence tested once per block
LANE = 128


def _round_up(x, m):
    return ((x + m - 1) // m) * m


def ot_ce_kernel(pred_ref, target_ref, cm_ref, k_ref, out_ref, *, actual_b):
    pred = pred_ref[...].astype(jnp.float32)          # (C, Bt)  lane-dense
    tgt = target_ref[...]                             # (1, Bt)  int32
    n_class, bt = pred.shape

    cm = cm_ref[...]                                  # (C, C), symmetric
    K = k_ref[...]                                    # (C, C), symmetric (== clamped K_stab)

    # ---- validity mask over batch padding (batch is on the lane axis) -------
    col = pl.program_id(0) * bt + lax.broadcasted_iota(jnp.int32, (1, bt), 1)
    valid = col < actual_b                            # (1, Bt) bool

    # ---- one-hot target (class axis = sublanes) ------------------------------
    class_iota = lax.broadcasted_iota(jnp.int32, (n_class, bt), 0)
    one_hot = (class_iota == tgt).astype(jnp.float32)

    # ---- cross entropy: sum over valid columns (mean taken in the wrapper) ---
    cmax = jnp.max(pred, axis=0, keepdims=True)
    lse = cmax + jnp.log(jnp.sum(jnp.exp(pred - cmax), axis=0, keepdims=True))
    log_softmax = pred - lse
    ce_cols = -jnp.sum(one_hot * log_softmax, axis=0, keepdims=True)   # (1,Bt)
    ce_sum = jnp.sum(jnp.where(valid, ce_cols, 0.0))

    # ---- Sinkhorn marginals ---------------------------------------------------
    p = jnp.exp(log_softmax) + STAB
    mu = p / jnp.sum(p, axis=0, keepdims=True)
    t = one_hot + STAB
    nu = t / jnp.sum(t, axis=0, keepdims=True)
    log_mu = jnp.log(mu + STAB)                       # double-stab matches ref
    log_nu = jnp.log(nu + STAB)

    # logsumexp_j(log K[i,j] + w[j,b]) as a stabilized MXU matmul (K symmetric)
    def lse_k(w):                                     # w: (C, Bt)
        m = jnp.max(w, axis=0, keepdims=True)
        s = jnp.dot(K, jnp.exp(w - m), preferred_element_type=jnp.float32)
        return m + jnp.log(s)

    # ---- Sinkhorn loop: CHECK_EVERY unrolled updates per while-step ----------
    def cond_fn(carry):
        it, _, _, done = carry
        return jnp.logical_and(it < MAX_ITER, done == 0)

    def body_fn(carry):
        it, u, v, _ = carry
        u_prev, v_prev = u, v
        for _ in range(CHECK_EVERY):                  # trace-time unroll
            u_prev, v_prev = u, v
            u = log_mu - lse_k(v)
            v = log_nu - lse_k(u)
        # convergence metric of the *last* update in the block, valid cols only
        du = jnp.max(jnp.where(valid, jnp.abs(u - u_prev), 0.0))
        dv = jnp.max(jnp.where(valid, jnp.abs(v - v_prev), 0.0))
        conv = jnp.logical_and(du < TOL, dv < TOL)
        return (it + CHECK_EVERY, u, v, conv.astype(jnp.int32))

    u0 = jnp.zeros((n_class, bt), jnp.float32)
    v0 = jnp.zeros((n_class, bt), jnp.float32)
    _, u, v, _ = lax.while_loop(cond_fn, body_fn,
                                (jnp.int32(0), u0, v0, jnp.int32(0)))

    # ---- transport cost in factored diag(a)·K·diag(c) form --------------------
    # P1   = exp(u + logK + v) + stab
    # rowsum_i = exp(u_i + w1_i) + C*stab,   w1 = lse_k(v)
    # P2   = P1 * a_i,           a = mu / rowsum
    # colsum_j = exp(v_j + w2_j) + stab*sum_i a_i,  w2 = lse_k(u + log a)
    # P3   = P1 * a_i * c_j,     c = nu / colsum
    # cost = sum_ij P3 * cm   (stab term carried explicitly — no (Bt,C,C) temp)
    Kcm = K * cm                                      # formed once, post-loop
    w1 = lse_k(v)
    rowsum = jnp.exp(u + w1) + n_class * STAB
    a = mu / rowsum
    z = u + jnp.log(a)
    w2 = lse_k(z)
    colsum = jnp.exp(v + w2) + STAB * jnp.sum(a, axis=0, keepdims=True)
    c = nu / colsum
    y = v + jnp.log(c)

    zm = jnp.max(z, axis=0, keepdims=True)
    ym = jnp.max(y, axis=0, keepdims=True)
    e_z = jnp.exp(z - zm)
    e_y = jnp.exp(y - ym)
    term1 = jnp.exp(zm + ym) * jnp.sum(
        jnp.dot(Kcm, e_z, preferred_element_type=jnp.float32) * e_y,
        axis=0, keepdims=True)
    term2 = STAB * jnp.sum(
        jnp.dot(cm, a, preferred_element_type=jnp.float32) * c,
        axis=0, keepdims=True)
    cost = term1 + term2                              # (1, Bt)

    nan_flag = jnp.any(jnp.logical_and(jnp.isnan(cost), valid)).astype(
        jnp.float32)
    cost_sum = jnp.sum(jnp.where(valid, cost, 0.0))

    # ---- NaN-fallback alternate cost: cm[argmax mu, argmax nu] (analytic) ----
    denom = float(max((n_class - 1) ** 2, 1))
    mu_max = jnp.max(mu, axis=0, keepdims=True)
    pred_idx = jnp.min(jnp.where(mu == mu_max, class_iota, n_class),
                       axis=0, keepdims=True)         # first argmax, (1, Bt)
    diff = (pred_idx - tgt).astype(jnp.float32)       # argmax(nu) == target
    alt = diff * diff / denom
    alt_sum = jnp.sum(jnp.where(valid, alt, 0.0))

    # ---- emit per-tile partials as a lane-dense (8, 128) slab -----------------
    lane = lax.broadcasted_iota(jnp.int32, (8, 128), 1)
    sub = lax.broadcasted_iota(jnp.int32, (8, 128), 0)
    first = sub == 0
    slab = jnp.where(jnp.logical_and(first, lane == 0), ce_sum,
            jnp.where(jnp.logical_and(first, lane == 1), cost_sum,
             jnp.where(jnp.logical_and(first, lane == 2), alt_sum,
              jnp.where(jnp.logical_and(first, lane == 3), nan_flag, 0.0))))
    out_ref[0] = slab


@functools.lru_cache(maxsize=None)
def _vmem_limit_bytes():
    """Generation-aware VMEM limit: ~75% of physical per-TC VMEM."""
    cap = 64 * 1024 * 1024                            # v7x-safe fallback
    try:
        info = pltpu.get_tpu_info()
        cap = int(getattr(info, "vmem_capacity_bytes", cap))
    except Exception:
        pass
    return min((cap * 3) // 4, 96 * 1024 * 1024)


def _pick_block_b(batch, n_class, vmem_limit):
    """Batch tile on the lane axis: multiple of 128, sized to the working set."""
    budget = max(vmem_limit // 4, 4 * 1024 * 1024)
    c_lanes = _round_up(n_class, LANE)
    fixed = 4 * n_class * c_lanes * 4                 # cm + K (double-buffered), lane-padded
    per_col = 24 * n_class * 4                        # live (C, bt) f32 temps + dbuf pred col
    avail = max(budget - fixed, per_col * LANE)
    bt = max((int(avail // per_col) // LANE) * LANE, LANE)
    # At least two grid tiles when the batch allows (v7x megacore parallelism).
    if batch >= 2 * LANE:
        bt = min(bt, _round_up((batch + 1) // 2, LANE))
    bt = min(bt, _round_up(batch, LANE))
    return bt


@jax.jit
def ot_cross_entropy_loss(pred, target):
    batch, n_class = pred.shape
    vmem_limit = _vmem_limit_bytes()
    bt = _pick_block_b(batch, n_class, vmem_limit)
    num_tiles = (batch + bt - 1) // bt
    b_pad = num_tiles * bt

    # Lane-dense layout: classes on sublanes, batch on lanes.
    pred_t = pred.astype(jnp.float32).T               # (C, B)
    target_row = target.astype(jnp.int32).reshape(1, batch)
    if b_pad != batch:
        pred_t = jnp.pad(pred_t, ((0, 0), (0, b_pad - batch)))
        target_row = jnp.pad(target_row, ((0, 0), (0, b_pad - batch)))

    # Grid-invariant (C, C) constants, hoisted out of the kernel.
    classes = jnp.arange(n_class, dtype=jnp.float32)
    cm = (classes[None, :] - classes[:, None]) ** 2
    cm = cm / float(max((n_class - 1) ** 2, 1))       # normalized cost matrix
    K = jnp.maximum(jnp.exp(-cm / EPS), STAB)         # == clamped K_stab

    kernel = functools.partial(ot_ce_kernel, actual_b=batch)
    parts = pl.pallas_call(
        kernel,
        out_shape=jax.ShapeDtypeStruct((num_tiles, 8, 128), jnp.float32),
        grid=(num_tiles,),
        in_specs=[
            pl.BlockSpec((n_class, bt), lambda i: (0, i)),
            pl.BlockSpec((1, bt), lambda i: (0, i)),
            pl.BlockSpec((n_class, n_class), lambda i: (0, 0)),
            pl.BlockSpec((n_class, n_class), lambda i: (0, 0)),
        ],
        out_specs=pl.BlockSpec((1, 8, 128), lambda i: (i, 0, 0)),
        compiler_params=pltpu.CompilerParams(
            dimension_semantics=("parallel",),
            vmem_limit_bytes=vmem_limit),
    )(pred_t, target_row, cm, K)

    ce = jnp.sum(parts[:, 0, 0]) / batch
    any_nan = jnp.sum(parts[:, 0, 3]) > 0.0
    ot = jnp.where(any_nan,
                   jnp.sum(parts[:, 0, 2]) / batch,   # alt-cost mean (NaN path)
                   jnp.sum(parts[:, 0, 1]) / batch)   # transport-cost mean

    if ALPHA == 0.0:
        # TODO(synk): a CE-only kernel could skip the OT partials entirely.
        return ce

    combined = (1.0 - ALPHA) * ce + ALPHA * ot
    combined = jnp.where(jnp.logical_or(jnp.isnan(ot), jnp.isnan(combined)),
                         ce, combined)
    return combined


if __name__ == "__main__":
    B, C = 8, 16
    key = jax.random.PRNGKey(0)
    k_pred, k_tgt = jax.random.split(key)
    pred = jax.random.normal(k_pred, (B, C), dtype=jnp.float32)
    target = jax.random.randint(k_tgt, (B,), 0, C, dtype=jnp.int32)

    loss = ot_cross_entropy_loss(pred, target)
    jax.block_until_ready(loss)
    assert loss.shape == () and bool(jnp.isfinite(loss))
    print("KERNEL_OK")
</pallas_src>

<mosaic_0001>
module attributes {stable_mosaic.version = 11 : i64} {
  func.func @ot_ce_kernel(%arg0: i32, %arg1: memref<16x128xf32, #tpu.memory_space<vmem>>, %arg2: memref<1x128xi32, #tpu.memory_space<vmem>>, %arg3: memref<16x16xf32, #tpu.memory_space<vmem>>, %arg4: memref<16x16xf32, #tpu.memory_space<vmem>>, %arg5: memref<1x8x128xf32, #tpu.memory_space<vmem>>) attributes {dimension_semantics = [#tpu.dimension_semantics<parallel>], iteration_bounds = array<i64: 1>, scalar_prefetch = 0 : i64, scratch_operands = 0 : i64, tpu.core_type = #tpu.core_type<tc>, window_params = [{transform_indices = @transform_0, window_bounds = array<i64: 16, 128>}, {transform_indices = @transform_1, window_bounds = array<i64: 1, 128>}, {pipeline_mode = #tpu.pipeline_mode<synchronous>, transform_indices = @transform_2, window_bounds = array<i64: 16, 16>}, {pipeline_mode = #tpu.pipeline_mode<synchronous>, transform_indices = @transform_3, window_bounds = array<i64: 16, 16>}, {transform_indices = @transform_4, window_bounds = array<i64: 1, 8, 128>}]} {
    %c0 = arith.constant 0 : index
    %c0_0 = arith.constant 0 : index
    %0 = vector.load %arg1[%c0, %c0_0] : memref<16x128xf32, #tpu.memory_space<vmem>>, vector<16x128xf32>
    %c0_1 = arith.constant 0 : index
    %c0_2 = arith.constant 0 : index
    %1 = vector.load %arg2[%c0_1, %c0_2] : memref<1x128xi32, #tpu.memory_space<vmem>>, vector<1x128xi32>
    %c0_3 = arith.constant 0 : index
    %c0_4 = arith.constant 0 : index
    %2 = vector.load %arg3[%c0_3, %c0_4] : memref<16x16xf32, #tpu.memory_space<vmem>>, vector<16x16xf32>
    %c0_5 = arith.constant 0 : index
    %c0_6 = arith.constant 0 : index
    %3 = vector.load %arg4[%c0_5, %c0_6] : memref<16x16xf32, #tpu.memory_space<vmem>>, vector<16x16xf32>
    %c128_i32 = arith.constant 128 : i32
    %4 = arith.muli %arg0, %c128_i32 : i32
    %5 = tpu.iota {dimensions = array<i32: 1>} : vector<1x128xi32>
    %6 = vector.broadcast %4 : i32 to vector<1x128xi32>
    %7 = arith.addi %6, %5 : vector<1x128xi32>
    %c8_i32 = arith.constant 8 : i32
    %8 = vector.broadcast %c8_i32 : i32 to vector<1x128xi32>
    %9 = arith.cmpi slt, %7, %8 : vector<1x128xi32>
    %10 = tpu.iota {dimensions = array<i32: 0>} : vector<16x128xi32>
    %11 = vector.broadcast %1 : vector<1x128xi32> to vector<16x128xi32>
    %12 = arith.cmpi eq, %10, %11 : vector<16x128xi32>
    %13 = arith.extui %12 : vector<16x128xi1> to vector<16x128xi32>
    %14 = arith.sitofp %13 : vector<16x128xi32> to vector<16x128xf32>
    %cst = arith.constant dense<0xFF800000> : vector<128xf32>
    %15 = vector.multi_reduction <maximumf>, %0, %cst [0] : vector<16x128xf32> to vector<128xf32>
    %16 = vector.shape_cast %15 : vector<128xf32> to vector<1x128xf32>
    %17 = vector.broadcast %16 : vector<1x128xf32> to vector<16x128xf32>
    %18 = arith.subf %0, %17 : vector<16x128xf32>
    %19 = math.exp %18 : vector<16x128xf32>
    %cst_7 = arith.constant dense<0.000000e+00> : vector<128xf32>
    %20 = vector.multi_reduction <add>, %19, %cst_7 [0] : vector<16x128xf32> to vector<128xf32>
    %21 = vector.shape_cast %20 : vector<128xf32> to vector<1x128xf32>
    %22 = math.log %21 : vector<1x128xf32>
    %23 = arith.addf %16, %22 : vector<1x128xf32>
    %24 = vector.broadcast %23 : vector<1x128xf32> to vector<16x128xf32>
    %25 = arith.subf %0, %24 : vector<16x128xf32>
    %26 = arith.mulf %14, %25 : vector<16x128xf32>
    %cst_8 = arith.constant dense<0.000000e+00> : vector<128xf32>
    %27 = vector.multi_reduction <add>, %26, %cst_8 [0] : vector<16x128xf32> to vector<128xf32>
    %28 = vector.shape_cast %27 : vector<128xf32> to vector<1x128xf32>
    %cst_9 = arith.constant 0.000000e+00 : f32
    %29 = vector.broadcast %cst_9 : f32 to vector<1x128xf32>
    %30 = arith.subf %29, %28 : vector<1x128xf32>
    %cst_10 = arith.constant 0.000000e+00 : f32
    %31 = vector.broadcast %cst_10 : f32 to vector<1x128xf32>
    %32 = arith.select %9, %30, %31 : vector<1x128xi1>, vector<1x128xf32>
    %33 = vector.shape_cast %32 : vector<1x128xf32> to vector<1x1x128xf32>
    %cst_11 = arith.constant dense<0.000000e+00> : vector<1xf32>
    %34 = vector.multi_reduction <add>, %33, %cst_11 [1, 2] : vector<1x1x128xf32> to vector<1xf32>
    %35 = vector.shape_cast %34 : vector<1xf32> to vector<1x1x1xf32>
    %36 = vector.extract %35[0, 0, 0] : f32 from vector<1x1x1xf32>
    %37 = math.exp %25 : vector<16x128xf32>
    %cst_12 = arith.constant 9.99999997E-7 : f32
    %38 = vector.broadcast %cst_12 : f32 to vector<16x128xf32>
    %39 = arith.addf %37, %38 : vector<16x128xf32>
    %cst_13 = arith.constant dense<0.000000e+00> : vector<128xf32>
    %40 = vector.multi_reduction <add>, %39, %cst_13 [0] : vector<16x128xf32> to vector<128xf32>
    %41 = vector.shape_cast %40 : vector<128xf32> to vector<1x128xf32>
    %42 = vector.broadcast %41 : vector<1x128xf32> to vector<16x128xf32>
    %43 = arith.divf %39, %42 : vector<16x128xf32>
    %cst_14 = arith.constant 9.99999997E-7 : f32
    %44 = vector.broadcast %cst_14 : f32 to vector<16x128xf32>
    %45 = arith.addf %14, %44 : vector<16x128xf32>
    %cst_15 = arith.constant dense<0.000000e+00> : vector<128xf32>
    %46 = vector.multi_reduction <add>, %45, %cst_15 [0] : vector<16x128xf32> to vector<128xf32>
    %47 = vector.shape_cast %46 : vector<128xf32> to vector<1x128xf32>
    %48 = vector.broadcast %47 : vector<1x128xf32> to vector<16x128xf32>
    %49 = arith.divf %45, %48 : vector<16x128xf32>
    %cst_16 = arith.constant 9.99999997E-7 : f32
    %50 = vector.broadcast %cst_16 : f32 to vector<16x128xf32>
    %51 = arith.addf %43, %50 : vector<16x128xf32>
    %52 = math.log %51 : vector<16x128xf32>
    %cst_17 = arith.constant 9.99999997E-7 : f32
    %53 = vector.broadcast %cst_17 : f32 to vector<16x128xf32>
    %54 = arith.addf %49, %53 : vector<16x128xf32>
    %55 = math.log %54 : vector<16x128xf32>
    %cst_18 = arith.constant 0.000000e+00 : f32
    %56 = vector.broadcast %cst_18 : f32 to vector<16x128xf32>
    %cst_19 = arith.constant 0.000000e+00 : f32
    %57 = vector.broadcast %cst_19 : f32 to vector<16x128xf32>
    %c0_i32 = arith.constant 0 : i32
    %c0_i32_20 = arith.constant 0 : i32
    %58:4 = scf.while (%arg6 = %c0_i32, %arg7 = %56, %arg8 = %57, %arg9 = %c0_i32_20) : (i32, vector<16x128xf32>, vector<16x128xf32>, i32) -> (i32, vector<16x128xf32>, vector<16x128xf32>, i32) {
      %c100_i32 = arith.constant 100 : i32
      %185 = arith.cmpi slt, %arg6, %c100_i32 : i32
      %c0_i32_52 = arith.constant 0 : i32
      %186 = arith.cmpi eq, %arg9, %c0_i32_52 : i32
      %187 = arith.andi %185, %186 : i1
      scf.condition(%187) %arg6, %arg7, %arg8, %arg9 : i32, vector<16x128xf32>, vector<16x128xf32>, i32
    } do {
    ^bb0(%arg6: i32, %arg7: vector<16x128xf32>, %arg8: vector<16x128xf32>, %arg9: i32):
      %cst_52 = arith.constant dense<0xFF800000> : vector<128xf32>
      %185 = vector.multi_reduction <maximumf>, %arg8, %cst_52 [0] : vector<16x128xf32> to vector<128xf32>
      %186 = vector.shape_cast %185 : vector<128xf32> to vector<1x128xf32>
      %187 = vector.broadcast %186 : vector<1x128xf32> to vector<16x128xf32>
      %188 = arith.subf %arg8, %187 : vector<16x128xf32>
      %189 = math.exp %188 : vector<16x128xf32>
      %cst_53 = arith.constant dense<0.000000e+00> : vector<16x128xf32>
      %190 = tpu.matmul %3, %189, %cst_53 {dimension_numbers = #tpu.dot_dimension_numbers<[1], [0], [0], [1], [0, 0, 1, 1], [], []>} : vector<16x16xf32>, vector<16x128xf32>, vector<16x128xf32> -> vector<16x128xf32>
      %191 = math.log %190 : vector<16x128xf32>
      %192 = vector.broadcast %186 : vector<1x128xf32> to vector<16x128xf32>
      %193 = arith.addf %192, %191 : vector<16x128xf32>
      %194 = arith.subf %52, %193 : vector<16x128xf32>
      %cst_54 = arith.constant dense<0xFF800000> : vector<128xf32>
      %195 = vector.multi_reduction <maximumf>, %194, %cst_54 [0] : vector<16x128xf32> to vector<128xf32>
      %196 = vector.shape_cast %195 : vector<128xf32> to vector<1x128xf32>
      %197 = vector.broadcast %196 : vector<1x128xf32> to vector<16x128xf32>
      %198 = arith.subf %194, %197 : vector<16x128xf32>
      %199 = math.exp %198 : vector<16x128xf32>
      %cst_55 = arith.constant dense<0.000000e+00> : vector<16x128xf32>
      %200 = tpu.matmul %3, %199, %cst_55 {dimension_numbers = #tpu.dot_dimension_numbers<[1], [0], [0], [1], [0, 0, 1, 1], [], []>} : vector<16x16xf32>, vector<16x128xf32>, vector<16x128xf32> -> vector<16x128xf32>
      %201 = math.log %200 : vector<16x128xf32>
      %202 = vector.broadcast %196 : vector<1x128xf32> to vector<16x128xf32>
      %203 = arith.addf %202, %201 : vector<16x128xf32>
      %204 = arith.subf %55, %203 : vector<16x128xf32>
      %cst_56 = arith.constant dense<0xFF800000> : vector<128xf32>
      %205 = vector.multi_reduction <maximumf>, %204, %cst_56 [0] : vector<16x128xf32> to vector<128xf32>
      %206 = vector.shape_cast %205 : vector<128xf32> to vector<1x128xf32>
      %207 = vector.broadcast %206 : vector<1x128xf32> to vector<16x128xf32>
      %208 = arith.subf %204, %207 : vector<16x128xf32>
      %209 = math.exp %208 : vector<16x128xf32>
      %cst_57 = arith.constant dense<0.000000e+00> : vector<16x128xf32>
      %210 = tpu.matmul %3, %209, %cst_57 {dimension_numbers = #tpu.dot_dimension_numbers<[1], [0], [0], [1], [0, 0, 1, 1], [], []>} : vector<16x16xf32>, vector<16x128xf32>, vector<16x128xf32> -> vector<16x128xf32>
      %211 = math.log %210 : vector<16x128xf32>
      %212 = vector.broadcast %206 : vector<1x128xf32> to vector<16x128xf32>
      %213 = arith.addf %212, %211 : vector<16x128xf32>
      %214 = arith.subf %52, %213 : vector<16x128xf32>
      %cst_58 = arith.constant dense<0xFF800000> : vector<128xf32>
      %215 = vector.multi_reduction <maximumf>, %214, %cst_58 [0] : vector<16x128xf32> to vector<128xf32>
      %216 = vector.shape_cast %215 : vector<128xf32> to vector<1x128xf32>
      %217 = vector.broadcast %216 : vector<1x128xf32> to vector<16x128xf32>
      %218 = arith.subf %214, %217 : vector<16x128xf32>
      %219 = math.exp %218 : vector<16x128xf32>
      %cst_59 = arith.constant dense<0.000000e+00> : vector<16x128xf32>
      %220 = tpu.matmul %3, %219, %cst_59 {dimension_numbers = #tpu.dot_dimension_numbers<[1], [0], [0], [1], [0, 0, 1, 1], [], []>} : vector<16x16xf32>, vector<16x128xf32>, vector<16x128xf32> -> vector<16x128xf32>
      %221 = math.log %220 : vector<16x128xf32>
      %222 = vector.broadcast %216 : vector<1x128xf32> to vector<16x128xf32>
      %223 = arith.addf %222, %221 : vector<16x128xf32>
      %224 = arith.subf %55, %223 : vector<16x128xf32>
      %cst_60 = arith.constant dense<0xFF800000> : vector<128xf32>
      %225 = vector.multi_reduction <maximumf>, %224, %cst_60 [0] : vector<16x128xf32> to vector<128xf32>
      %226 = vector.shape_cast %225 : vector<128xf32> to vector<1x128xf32>
      %227 = vector.broadcast %226 : vector<1x128xf32> to vector<16x128xf32>
      %228 = arith.subf %224, %227 : vector<16x128xf32>
      %229 = math.exp %228 : vector<16x128xf32>
      %cst_61 = arith.constant dense<0.000000e+00> : vector<16x128xf32>
      %230 = tpu.matmul %3, %229, %cst_61 {dimension_numbers = #tpu.dot_dimension_numbers<[1], [0], [0], [1], [0, 0, 1, 1], [], []>} : vector<16x16xf32>, vector<16x128xf32>, vector<16x128xf32> -> vector<16x128xf32>
      %231 = math.log %230 : vector<16x128xf32>
      %232 = vector.broadcast %226 : vector<1x128xf32> to vector<16x128xf32>
      %233 = arith.addf %232, %231 : vector<16x128xf32>
      %234 = arith.subf %52, %233 : vector<16x128xf32>
      %cst_62 = arith.constant dense<0xFF800000> : vector<128xf32>
      %235 = vector.multi_reduction <maximumf>, %234, %cst_62 [0] : vector<16x128xf32> to vector<128xf32>
      %236 = vector.shape_cast %235 : vector<128xf32> to vector<1x128xf32>
      %237 = vector.broadcast %236 : vector<1x128xf32> to vector<16x128xf32>
      %238 = arith.subf %234, %237 : vector<16x128xf32>
      %239 = math.exp %238 : vector<16x128xf32>
      %cst_63 = arith.constant dense<0.000000e+00> : vector<16x128xf32>
      %240 = tpu.matmul %3, %239, %cst_63 {dimension_numbers = #tpu.dot_dimension_numbers<[1], [0], [0], [1], [0, 0, 1, 1], [], []>} : vector<16x16xf32>, vector<16x128xf32>, vector<16x128xf32> -> vector<16x128xf32>
      %241 = math.log %240 : vector<16x128xf32>
      %242 = vector.broadcast %236 : vector<1x128xf32> to vector<16x128xf32>
      %243 = arith.addf %242, %241 : vector<16x128xf32>
      %244 = arith.subf %55, %243 : vector<16x128xf32>
      %cst_64 = arith.constant dense<0xFF800000> : vector<128xf32>
      %245 = vector.multi_reduction <maximumf>, %244, %cst_64 [0] : vector<16x128xf32> to vector<128xf32>
      %246 = vector.shape_cast %245 : vector<128xf32> to vector<1x128xf32>
      %247 = vector.broadcast %246 : vector<1x128xf32> to vector<16x128xf32>
      %248 = arith.subf %244, %247 : vector<16x128xf32>
      %249 = math.exp %248 : vector<16x128xf32>
      %cst_65 = arith.constant dense<0.000000e+00> : vector<16x128xf32>
      %250 = tpu.matmul %3, %249, %cst_65 {dimension_numbers = #tpu.dot_dimension_numbers<[1], [0], [0], [1], [0, 0, 1, 1], [], []>} : vector<16x16xf32>, vector<16x128xf32>, vector<16x128xf32> -> vector<16x128xf32>
      %251 = math.log %250 : vector<16x128xf32>
      %252 = vector.broadcast %246 : vector<1x128xf32> to vector<16x128xf32>
      %253 = arith.addf %252, %251 : vector<16x128xf32>
      %254 = arith.subf %52, %253 : vector<16x128xf32>
      %cst_66 = arith.constant dense<0xFF800000> : vector<128xf32>
      %255 = vector.multi_reduction <maximumf>, %254, %cst_66 [0] : vector<16x128xf32> to vector<128xf32>
      %256 = vector.shape_cast %255 : vector<128xf32> to vector<1x128xf32>
      %257 = vector.broadcast %256 : vector<1x128xf32> to vector<16x128xf32>
      %258 = arith.subf %254, %257 : vector<16x128xf32>
      %259 = math.exp %258 : vector<16x128xf32>
      %cst_67 = arith.constant dense<0.000000e+00> : vector<16x128xf32>
      %260 = tpu.matmul %3, %259, %cst_67 {dimension_numbers = #tpu.dot_dimension_numbers<[1], [0], [0], [1], [0, 0, 1, 1], [], []>} : vector<16x16xf32>, vector<16x128xf32>, vector<16x128xf32> -> vector<16x128xf32>
      %261 = math.log %260 : vector<16x128xf32>
      %262 = vector.broadcast %256 : vector<1x128xf32> to vector<16x128xf32>
      %263 = arith.addf %262, %261 : vector<16x128xf32>
      %264 = arith.subf %55, %263 : vector<16x128xf32>
      %cst_68 = arith.constant dense<0xFF800000> : vector<128xf32>
      %265 = vector.multi_reduction <maximumf>, %264, %cst_68 [0] : vector<16x128xf32> to vector<128xf32>
      %266 = vector.shape_cast %265 : vector<128xf32> to vector<1x128xf32>
      %267 = vector.broadcast %266 : vector<1x128xf32> to vector<16x128xf32>
      %268 = arith.subf %264, %267 : vector<16x128xf32>
      %269 = math.exp %268 : vector<16x128xf32>
      %cst_69 = arith.constant dense<0.000000e+00> : vector<16x128xf32>
      %270 = tpu.matmul %3, %269, %cst_69 {dimension_numbers = #tpu.dot_dimension_numbers<[1], [0], [0], [1], [0, 0, 1, 1], [], []>} : vector<16x16xf32>, vector<16x128xf32>, vector<16x128xf32> -> vector<16x128xf32>
      %271 = math.log %270 : vector<16x128xf32>
      %272 = vector.broadcast %266 : vector<1x128xf32> to vector<16x128xf32>
      %273 = arith.addf %272, %271 : vector<16x128xf32>
      %274 = arith.subf %52, %273 : vector<16x128xf32>
      %cst_70 = arith.constant dense<0xFF800000> : vector<128xf32>
      %275 = vector.multi_reduction <maximumf>, %274, %cst_70 [0] : vector<16x128xf32> to vector<128xf32>
      %276 = vector.shape_cast %275 : vector<128xf32> to vector<1x128xf32>
      %277 = vector.broadcast %276 : vector<1x128xf32> to vector<16x128xf32>
      %278 = arith.subf %274, %277 : vector<16x128xf32>
      %279 = math.exp %278 : vector<16x128xf32>
      %cst_71 = arith.constant dense<0.000000e+00> : vector<16x128xf32>
      %280 = tpu.matmul %3, %279, %cst_71 {dimension_numbers = #tpu.dot_dimension_numbers<[1], [0], [0], [1], [0, 0, 1, 1], [], []>} : vector<16x16xf32>, vector<16x128xf32>, vector<16x128xf32> -> vector<16x128xf32>
      %281 = math.log %280 : vector<16x128xf32>
      %282 = vector.broadcast %276 : vector<1x128xf32> to vector<16x128xf32>
      %283 = arith.addf %282, %281 : vector<16x128xf32>
      %284 = arith.subf %55, %283 : vector<16x128xf32>
      %285 = arith.subf %274, %254 : vector<16x128xf32>
      %286 = math.absf %285 : vector<16x128xf32>
      %cst_72 = arith.constant 0.000000e+00 : f32
      %287 = vector.shape_cast %9 : vector<1x128xi1> to vector<1x128xi1>
      %288 = vector.broadcast %287 : vector<1x128xi1> to vector<16x128xi1>
      %289 = vector.broadcast %cst_72 : f32 to vector<16x128xf32>
      %290 = arith.select %288, %286, %289 : vector<16x128xi1>, vector<16x128xf32>
      %291 = vector.shape_cast %290 : vector<16x128xf32> to vector<1x16x128xf32>
      %cst_73 = arith.constant dense<0xFF800000> : vector<1xf32>
      %292 = vector.multi_reduction <maximumf>, %291, %cst_73 [1, 2] : vector<1x16x128xf32> to vector<1xf32>
      %293 = vector.shape_cast %292 : vector<1xf32> to vector<1x1x1xf32>
      %294 = vector.extract %293[0, 0, 0] : f32 from vector<1x1x1xf32>
      %295 = arith.subf %284, %264 : vector<16x128xf32>
      %296 = math.absf %295 : vector<16x128xf32>
      %cst_74 = arith.constant 0.000000e+00 : f32
      %297 = vector.shape_cast %9 : vector<1x128xi1> to vector<1x128xi1>
      %298 = vector.broadcast %297 : vector<1x128xi1> to vector<16x128xi1>
      %299 = vector.broadcast %cst_74 : f32 to vector<16x128xf32>
      %300 = arith.select %298, %296, %299 : vector<16x128xi1>, vector<16x128xf32>
      %301 = vector.shape_cast %300 : vector<16x128xf32> to vector<1x16x128xf32>
      %cst_75 = arith.constant dense<0xFF800000> : vector<1xf32>
      %302 = vector.multi_reduction <maximumf>, %301, %cst_75 [1, 2] : vector<1x16x128xf32> to vector<1xf32>
      %303 = vector.shape_cast %302 : vector<1xf32> to vector<1x1x1xf32>
      %304 = vector.extract %303[0, 0, 0] : f32 from vector<1x1x1xf32>
      %cst_76 = arith.constant 9.99999974E-5 : f32
      %305 = arith.cmpf olt, %294, %cst_76 : f32
      %cst_77 = arith.constant 9.99999974E-5 : f32
      %306 = arith.cmpf olt, %304, %cst_77 : f32
      %307 = arith.andi %305, %306 : i1
      %c5_i32 = arith.constant 5 : i32
      %308 = arith.addi %arg6, %c5_i32 : i32
      %309 = arith.extui %307 : i1 to i32
      scf.yield %308, %274, %284, %309 : i32, vector<16x128xf32>, vector<16x128xf32>, i32
    }
    %59 = arith.mulf %3, %2 : vector<16x16xf32>
    %cst_21 = arith.constant dense<0xFF800000> : vector<128xf32>
    %60 = vector.multi_reduction <maximumf>, %58#2, %cst_21 [0] : vector<16x128xf32> to vector<128xf32>
    %61 = vector.shape_cast %60 : vector<128xf32> to vector<1x128xf32>
    %62 = vector.broadcast %61 : vector<1x128xf32> to vector<16x128xf32>
    %63 = arith.subf %58#2, %62 : vector<16x128xf32>
    %64 = math.exp %63 : vector<16x128xf32>
    %cst_22 = arith.constant dense<0.000000e+00> : vector<16x128xf32>
    %65 = tpu.matmul %3, %64, %cst_22 {dimension_numbers = #tpu.dot_dimension_numbers<[1], [0], [0], [1], [0, 0, 1, 1], [], []>} : vector<16x16xf32>, vector<16x128xf32>, vector<16x128xf32> -> vector<16x128xf32>
    %66 = math.log %65 : vector<16x128xf32>
    %67 = vector.broadcast %61 : vector<1x128xf32> to vector<16x128xf32>
    %68 = arith.addf %67, %66 : vector<16x128xf32>
    %69 = arith.addf %58#1, %68 : vector<16x128xf32>
    %70 = math.exp %69 : vector<16x128xf32>
    %cst_23 = arith.constant 1.600000e-05 : f32
    %71 = vector.broadcast %cst_23 : f32 to vector<16x128xf32>
    %72 = arith.addf %70, %71 : vector<16x128xf32>
    %73 = arith.divf %43, %72 : vector<16x128xf32>
    %74 = math.log %73 : vector<16x128xf32>
    %75 = arith.addf %58#1, %74 : vector<16x128xf32>
    %cst_24 = arith.constant dense<0xFF800000> : vector<128xf32>
    %76 = vector.multi_reduction <maximumf>, %75, %cst_24 [0] : vector<16x128xf32> to vector<128xf32>
    %77 = vector.shape_cast %76 : vector<128xf32> to vector<1x128xf32>
    %78 = vector.broadcast %77 : vector<1x128xf32> to vector<16x128xf32>
    %79 = arith.subf %75, %78 : vector<16x128xf32>
    %80 = math.exp %79 : vector<16x128xf32>
    %cst_25 = arith.constant dense<0.000000e+00> : vector<16x128xf32>
    %81 = tpu.matmul %3, %80, %cst_25 {dimension_numbers = #tpu.dot_dimension_numbers<[1], [0], [0], [1], [0, 0, 1, 1], [], []>} : vector<16x16xf32>, vector<16x128xf32>, vector<16x128xf32> -> vector<16x128xf32>
    %82 = math.log %81 : vector<16x128xf32>
    %83 = vector.broadcast %77 : vector<1x128xf32> to vector<16x128xf32>
    %84 = arith.addf %83, %82 : vector<16x128xf32>
    %85 = arith.addf %58#2, %84 : vector<16x128xf32>
    %86 = math.exp %85 : vector<16x128xf32>
    %cst_26 = arith.constant dense<0.000000e+00> : vector<128xf32>
    %87 = vector.multi_reduction <add>, %73, %cst_26 [0] : vector<16x128xf32> to vector<128xf32>
    %88 = vector.shape_cast %87 : vector<128xf32> to vector<1x128xf32>
    %cst_27 = arith.constant 9.99999997E-7 : f32
    %89 = vector.broadcast %cst_27 : f32 to vector<1x128xf32>
    %90 = arith.mulf %89, %88 : vector<1x128xf32>
    %91 = vector.broadcast %90 : vector<1x128xf32> to vector<16x128xf32>
    %92 = arith.addf %86, %91 : vector<16x128xf32>
    %93 = arith.divf %49, %92 : vector<16x128xf32>
    %94 = math.log %93 : vector<16x128xf32>
    %95 = arith.addf %58#2, %94 : vector<16x128xf32>
    %cst_28 = arith.constant dense<0xFF800000> : vector<128xf32>
    %96 = vector.multi_reduction <maximumf>, %75, %cst_28 [0] : vector<16x128xf32> to vector<128xf32>
    %97 = vector.shape_cast %96 : vector<128xf32> to vector<1x128xf32>
    %cst_29 = arith.constant dense<0xFF800000> : vector<128xf32>
    %98 = vector.multi_reduction <maximumf>, %95, %cst_29 [0] : vector<16x128xf32> to vector<128xf32>
    %99 = vector.shape_cast %98 : vector<128xf32> to vector<1x128xf32>
    %100 = vector.broadcast %97 : vector<1x128xf32> to vector<16x128xf32>
    %101 = arith.subf %75, %100 : vector<16x128xf32>
    %102 = math.exp %101 : vector<16x128xf32>
    %103 = vector.broadcast %99 : vector<1x128xf32> to vector<16x128xf32>
    %104 = arith.subf %95, %103 : vector<16x128xf32>
    %105 = math.exp %104 : vector<16x128xf32>
    %106 = arith.addf %97, %99 : vector<1x128xf32>
    %107 = math.exp %106 : vector<1x128xf32>
    %cst_30 = arith.constant dense<0.000000e+00> : vector<16x128xf32>
    %108 = tpu.matmul %59, %102, %cst_30 {dimension_numbers = #tpu.dot_dimension_numbers<[1], [0], [0], [1], [0, 0, 1, 1], [], []>} : vector<16x16xf32>, vector<16x128xf32>, vector<16x128xf32> -> vector<16x128xf32>
    %109 = arith.mulf %108, %105 : vector<16x128xf32>
    %cst_31 = arith.constant dense<0.000000e+00> : vector<128xf32>
    %110 = vector.multi_reduction <add>, %109, %cst_31 [0] : vector<16x128xf32> to vector<128xf32>
    %111 = vector.shape_cast %110 : vector<128xf32> to vector<1x128xf32>
    %112 = arith.mulf %107, %111 : vector<1x128xf32>
    %cst_32 = arith.constant dense<0.000000e+00> : vector<16x128xf32>
    %113 = tpu.matmul %2, %73, %cst_32 {dimension_numbers = #tpu.dot_dimension_numbers<[1], [0], [0], [1], [0, 0, 1, 1], [], []>} : vector<16x16xf32>, vector<16x128xf32>, vector<16x128xf32> -> vector<16x128xf32>
    %114 = arith.mulf %113, %93 : vector<16x128xf32>
    %cst_33 = arith.constant dense<0.000000e+00> : vector<128xf32>
    %115 = vector.multi_reduction <add>, %114, %cst_33 [0] : vector<16x128xf32> to vector<128xf32>
    %116 = vector.shape_cast %115 : vector<128xf32> to vector<1x128xf32>
    %cst_34 = arith.constant 9.99999997E-7 : f32
    %117 = vector.broadcast %cst_34 : f32 to vector<1x128xf32>
    %118 = arith.mulf %117, %116 : vector<1x128xf32>
    %119 = arith.addf %112, %118 : vector<1x128xf32>
    %120 = arith.cmpf one, %119, %119 : vector<1x128xf32>
    %121 = arith.andi %120, %9 : vector<1x128xi1>
    %cst_35 = arith.constant 1.000000e+00 : f32
    %cst_36 = arith.constant 0.000000e+00 : f32
    %122 = vector.broadcast %cst_35 : f32 to vector<1x128xf32>
    %123 = vector.broadcast %cst_36 : f32 to vector<1x128xf32>
    %124 = arith.select %121, %122, %123 : vector<1x128xi1>, vector<1x128xf32>
    %125 = vector.shape_cast %124 : vector<1x128xf32> to vector<1x1x128xf32>
    %cst_37 = arith.constant dense<0xFF800000> : vector<1xf32>
    %126 = vector.multi_reduction <maximumf>, %125, %cst_37 [1, 2] : vector<1x1x128xf32> to vector<1xf32>
    %127 = vector.shape_cast %126 : vector<1xf32> to vector<1x1x1xf32>
    %128 = vector.extract %127[0, 0, 0] : f32 from vector<1x1x1xf32>
    %cst_38 = arith.constant 0.000000e+00 : f32
    %129 = arith.cmpf ogt, %128, %cst_38 : f32
    %130 = arith.extui %129 : i1 to i32
    %131 = arith.sitofp %130 : i32 to f32
    %cst_39 = arith.constant 0.000000e+00 : f32
    %132 = vector.broadcast %cst_39 : f32 to vector<1x128xf32>
    %133 = arith.select %9, %119, %132 : vector<1x128xi1>, vector<1x128xf32>
    %134 = vector.shape_cast %133 : vector<1x128xf32> to vector<1x1x128xf32>
    %cst_40 = arith.constant dense<0.000000e+00> : vector<1xf32>
    %135 = vector.multi_reduction <add>, %134, %cst_40 [1, 2] : vector<1x1x128xf32> to vector<1xf32>
    %136 = vector.shape_cast %135 : vector<1xf32> to vector<1x1x1xf32>
    %137 = vector.extract %136[0, 0, 0] : f32 from vector<1x1x1xf32>
    %cst_41 = arith.constant dense<0xFF800000> : vector<128xf32>
    %138 = vector.multi_reduction <maximumf>, %43, %cst_41 [0] : vector<16x128xf32> to vector<128xf32>
    %139 = vector.shape_cast %138 : vector<128xf32> to vector<1x128xf32>
    %140 = vector.broadcast %139 : vector<1x128xf32> to vector<16x128xf32>
    %141 = arith.cmpf oeq, %43, %140 : vector<16x128xf32>
    %c16_i32 = arith.constant 16 : i32
    %142 = vector.broadcast %c16_i32 : i32 to vector<16x128xi32>
    %143 = arith.select %141, %10, %142 : vector<16x128xi1>, vector<16x128xi32>
    %cst_42 = arith.constant dense<2147483647> : vector<128xi32>
    %144 = vector.multi_reduction <minsi>, %143, %cst_42 [0] : vector<16x128xi32> to vector<128xi32>
    %145 = vector.shape_cast %144 : vector<128xi32> to vector<1x128xi32>
    %146 = arith.subi %145, %1 : vector<1x128xi32>
    %147 = arith.sitofp %146 : vector<1x128xi32> to vector<1x128xf32>
    %148 = arith.mulf %147, %147 : vector<1x128xf32>
    %cst_43 = arith.constant 2.250000e+02 : f32
    %149 = vector.broadcast %cst_43 : f32 to vector<1x128xf32>
    %150 = arith.divf %148, %149 : vector<1x128xf32>
    %cst_44 = arith.constant 0.000000e+00 : f32
    %151 = vector.broadcast %cst_44 : f32 to vector<1x128xf32>
    %152 = arith.select %9, %150, %151 : vector<1x128xi1>, vector<1x128xf32>
    %153 = vector.shape_cast %152 : vector<1x128xf32> to vector<1x1x128xf32>
    %cst_45 = arith.constant dense<0.000000e+00> : vector<1xf32>
    %154 = vector.multi_reduction <add>, %153, %cst_45 [1, 2] : vector<1x1x128xf32> to vector<1xf32>
    %155 = vector.shape_cast %154 : vector<1xf32> to vector<1x1x1xf32>
    %156 = vector.extract %155[0, 0, 0] : f32 from vector<1x1x1xf32>
    %157 = tpu.iota {dimensions = array<i32: 1>} : vector<8x128xi32>
    %158 = tpu.iota {dimensions = array<i32: 0>} : vector<8x128xi32>
    %c0_i32_46 = arith.constant 0 : i32
    %159 = vector.broadcast %c0_i32_46 : i32 to vector<8x128xi32>
    %160 = arith.cmpi eq, %158, %159 : vector<8x128xi32>
    %c0_i32_47 = arith.constant 0 : i32
    %161 = vector.broadcast %c0_i32_47 : i32 to vector<8x128xi32>
    %162 = arith.cmpi eq, %157, %161 : vector<8x128xi32>
    %163 = arith.andi %160, %162 : vector<8x128xi1>
    %c1_i32 = arith.constant 1 : i32
    %164 = vector.broadcast %c1_i32 : i32 to vector<8x128xi32>
    %165 = arith.cmpi eq, %157, %164 : vector<8x128xi32>
    %166 = arith.andi %160, %165 : vector<8x128xi1>
    %c2_i32 = arith.constant 2 : i32
    %167 = vector.broadcast %c2_i32 : i32 to vector<8x128xi32>
    %168 = arith.cmpi eq, %157, %167 : vector<8x128xi32>
    %169 = arith.andi %160, %168 : vector<8x128xi1>
    %c3_i32 = arith.constant 3 : i32
    %170 = vector.broadcast %c3_i32 : i32 to vector<8x128xi32>
    %171 = arith.cmpi eq, %157, %170 : vector<8x128xi32>
    %172 = arith.andi %160, %171 : vector<8x128xi1>
    %cst_48 = arith.constant 0.000000e+00 : f32
    %173 = vector.broadcast %131 : f32 to vector<8x128xf32>
    %174 = vector.broadcast %cst_48 : f32 to vector<8x128xf32>
    %175 = arith.select %172, %173, %174 : vector<8x128xi1>, vector<8x128xf32>
    %176 = vector.broadcast %156 : f32 to vector<8x128xf32>
    %177 = arith.select %169, %176, %175 : vector<8x128xi1>, vector<8x128xf32>
    %178 = vector.broadcast %137 : f32 to vector<8x128xf32>
    %179 = arith.select %166, %178, %177 : vector<8x128xi1>, vector<8x128xf32>
    %180 = vector.broadcast %36 : f32 to vector<8x128xf32>
    %181 = arith.select %163, %180, %179 : vector<8x128xi1>, vector<8x128xf32>
    %c0_49 = arith.constant 0 : index
    %c0_50 = arith.constant 0 : index
    %c0_51 = arith.constant 0 : index
    %182 = vector.load %arg5[%c0_49, %c0_50, %c0_51] : memref<1x8x128xf32, #tpu.memory_space<vmem>>, vector<1x8x128xf32>
    %183 = vector.shape_cast %182 : vector<1x8x128xf32> to vector<8x128xf32>
    %184 = vector.shape_cast %181 : vector<8x128xf32> to vector<1x8x128xf32>
    tpu.vector_store %arg5[%c0_49, %c0_50, %c0_51], %184 {strides = array<i32>} : memref<1x8x128xf32, #tpu.memory_space<vmem>>, vector<1x8x128xf32>,
    return
  }
  func.func @transform_0(%arg0: i32) -> (i32, i32) {
    %c0_i32 = arith.constant 0 : i32
    %c0_i32_0 = arith.constant 0 : i32
    return %c0_i32, %arg0 : i32, i32
  }
  func.func @transform_1(%arg0: i32) -> (i32, i32) {
    %c0_i32 = arith.constant 0 : i32
    %c0_i32_0 = arith.constant 0 : i32
    return %c0_i32, %arg0 : i32, i32
  }
  func.func @transform_2(%arg0: i32) -> (i32, i32) {
    %c0_i32 = arith.constant 0 : i32
    %c0_i32_0 = arith.constant 0 : i32
    %c0_i32_1 = arith.constant 0 : i32
    return %c0_i32, %c0_i32_0 : i32, i32
  }
  func.func @transform_3(%arg0: i32) -> (i32, i32) {
    %c0_i32 = arith.constant 0 : i32
    %c0_i32_0 = arith.constant 0 : i32
    %c0_i32_1 = arith.constant 0 : i32
    return %c0_i32, %c0_i32_0 : i32, i32
  }
  func.func @transform_4(%arg0: i32) -> (i32, i32, i32) {
    %c0_i32 = arith.constant 0 : i32
    %c0_i32_0 = arith.constant 0 : i32
    %c0_i32_1 = arith.constant 0 : i32
    return %arg0, %c0_i32, %c0_i32_0 : i32, i32, i32
  }
}

</mosaic_0001>

<bundles_post_ra>
// kernel: ot_cross_entropy_loss.1
= control target key start
LH: loop header
LB: loop body
LE: loop exit
PB: predicated region body
PF: predicated region fallthrough
CT: control target
= control target key end

     0   :  { %v25_v0 = vlaneseq  ;;  %v2140_v16 = vmov 0.0   ;;  %vm79_vm3 = vcmask 1040384   ;;  %s2444_s0 = inlined_call_operand.vmem [shape: f32[16,128], index: 0, kind: input, shape index: {}]   ;;  %s2445_s1 = inlined_call_operand.vmem [shape: s32[1,128], index: 1, kind: input, shape index: {}]   ;;  %s2446_s2 = inlined_call_operand.vmem [shape: f32[16,16], index: 2, kind: input, shape index: {}]   ;;  %s2447_s3 = inlined_call_operand.vmem [shape: f32[16,16], index: 3, kind: input, shape index: {}]   ;;  %s2448_s4 = inlined_call_operand.vmem [shape: f32[1,8,128], index: 4, kind: output, shape index: {}]  }
   0x1   :  { %v2169_v1 = vld [vmem:[%s2444_s0] sm:$0xff]  ;;  %v2174_v2 = vld [vmem:[%s2444_s0 + $0x8] sm:$0xff] }
   0x2   :  { %v2179_v3 = vld [vmem:[%s2446_s2] sm:$0xff]  ;;  %v2184_v4 = vld [vmem:[%s2446_s2 + $0x8] sm:$0xff]  ;;  %v2192_v6 = vshrl.u32 %v25_v0, 7  ;;  %v43_v7 = vmax.f32 %v2169_v1, %v2174_v2  ;;  %s2252_s2 = smov 0  }
   0x3   :  { %v2189_v5 = vld [vmem:[%s2447_s3] sm:$0xff]  ;;  %v2204_v9 = vld [vmem:[%s2447_s3 + $0x8] sm:$0xff] }
   0x4   :  { %v2199_v8 = vld [vmem:[%s2445_s1] sm:$0x1]  ;;  %v2207_v10 = vadd.s32 8, %v2192_v6  ;;  %v35_v11 = vsub.s32 0, %v2192_v6  ;;  %v44_v12 = vrot.slane %v43_v7, 4 }
   0x6   :  { %v36_v13 = vrot.slane %v2199_v8, %v35_v11  ;;  %v45_v14 = vmax.f32 %v43_v7, %v44_v12 }
   0x8   :  { %vm37_vm0 = vcmp.eq.s32.totalorder %v2192_v6, %v36_v13  ;;  %vm38_vm1 = vcmp.eq.s32.totalorder %v2207_v10, %v36_v13  ;;  %v46_v15 = vrot.slane %v45_v14, 2  ;;  %v2230_v13 = vand.u32 127, %v25_v0 }
   0x9   :  { %v1690_v17 = vsel %vm37_vm0, 1.0, %v2140_v16  ;;  %v1691_v18 = vsel %vm38_vm1, 1.0, %v2140_v16 }
   0xa   :  { %v47_v19 = vmax.f32 %v45_v14, %v46_v15  ;;  %v106_v20 = vadd.f32 1e-06, %v1690_v17  ;;  %v107_v21 = vadd.f32 1e-06, %v1691_v18  ;;  %vm29_vm2 = vcmp.lt.s32.totalorder %v2230_v13, 8 }
   0xc   :  { %v48_v22 = vrot.slane %v47_v19, 1  ;;  %v108_v23 = vadd.f32 %v107_v21, %v106_v20 }
   0xe   :  { %v49_v24 = vmax.f32 %v47_v19, %v48_v22  ;;  %v109_v25 = vrot.slane %v108_v23, 4 }
  0x10   :  { %v50_v26 = vsub.f32 %v2169_v1, %v49_v24  ;;  %v51_v27 = vsub.f32 %v2174_v2, %v49_v24  ;;  %v110_v28 = vadd.f32 %v109_v25, %v108_v23 }
  0x12   :  { %v52_v29 = vmul.f32 1.442695, %v50_v26  ;;  %v54_v30 = vmul.f32 1.442695, %v51_v27  ;;  %v111_v31 = vrot.slane %v110_v28, 2 }
  0x14   :  { %1968 = vpow2.f32 %v52_v29  ;;  %v112_v32 = vadd.f32 %v111_v31, %v110_v28 }
  0x15   :  { %1970 = vpow2.f32 %v54_v30 }
  0x16   :  { %v113_v33 = vrot.slane %v112_v32, 1 }
  0x18   :  { %v114_v34 = vadd.f32 %v113_v33, %v112_v32 }
  0x1a   :  { %1972 = vrcp.f32 %v114_v34 }
  0x1e   :  { %v1969_v35 = vpop.eup %1968 }
  0x1f   :  { %v1971_v36 = vpop.eup %1970 }
  0x20   :  { %v56_v37 = vadd.f32 %v1971_v36, %v1969_v35 }
  0x22   :  { %v57_v38 = vrot.slane %v56_v37, 4 }
  0x24   :  { %v1973_v39 = vpop.eup %1972  ;;  %v58_v40 = vadd.f32 %v57_v38, %v56_v37 }
  0x25   :  { %v2217_v41 = vmul.f32 %v1973_v39, %v106_v20  ;;  %v2219_v42 = vmul.f32 %v1973_v39, %v107_v21 }
  0x26   :  { %v59_v43 = vrot.slane %v58_v40, 2 }
  0x27   :  { %v124_v44 = vadd.f32 1e-06, %v2217_v41  ;;  %v125_v45 = vadd.f32 1e-06, %v2219_v42 }
  0x28   :  { %v60_v46 = vadd.f32 %v59_v43, %v58_v40 }
  0x29   :  { %1974 = vlog2.f32 %v124_v44 }
  0x2a   :  { %v61_v47 = vrot.slane %v60_v46, 1  ;;  %1976 = vlog2.f32 %v125_v45 }
  0x2c   :  { %v62_v48 = vadd.f32 %v61_v47, %v60_v46  ;;  %v2248_v46 = vmov 0.0   ;;  %v2250_v47 = vmov 0.0  }
  0x2e   :  { %1978 = vlog2.f32 %v62_v48 }
  0x33   :  { %v1975_v49 = vpop.eup %1974 }
  0x34   :  { %v1977_v50 = vpop.eup %1976  ;;  %v2223_v51 = vmul.f32 0.6931472, %v1975_v49 }
  0x35   :  { %v2225_v52 = vmul.f32 0.6931472, %v1977_v50 }
  0x38   :  { %v1979_v53 = vpop.eup %1978 }
  0x39   :  { %v64_v54 = vmul.f32 0.6931472, %v1979_v53 }
  0x3b   :  { %v65_v55 = vadd.f32 %v64_v54, %v49_v24 }
  0x3d   :  { %v66_v56 = vsub.f32 %v2169_v1, %v65_v55  ;;  %v67_v57 = vsub.f32 %v2174_v2, %v65_v55 }
  0x3f   :  { %v68_v58 = vmul.f32 %v1690_v17, %v66_v56  ;;  %v69_v59 = vmul.f32 %v1691_v18, %v67_v57  ;;  %v90_v60 = vmul.f32 1.442695, %v66_v56  ;;  %v92_v61 = vmul.f32 1.442695, %v67_v57 }
  0x41   :  { %v70_v62 = vadd.f32 %v69_v59, %v68_v58  ;;  %1980 = vpow2.f32 %v90_v60 }
  0x42   :  { %1982 = vpow2.f32 %v92_v61 }
  0x43   :  { %v71_v63 = vrot.slane %v70_v62, 4 }
  0x45   :  { %v72_v7 = vadd.f32 %v71_v63, %v70_v62 }
  0x47   :  { %v73_v11 = vrot.slane %v72_v7, 2 }
  0x49   :  { %v74_v12 = vadd.f32 %v73_v11, %v72_v7 }
  0x4b   :  { %v1981_v14 = vpop.eup %1980  ;;  %v75_v15 = vrot.slane %v74_v12, 1 }
  0x4c   :  { %v1983_v19 = vpop.eup %1982  ;;  %v94_v1 = vadd.f32 1e-06, %v1981_v14 }
  0x4d   :  { %v76_v20 = vadd.f32 %v75_v15, %v74_v12  ;;  %v95_v2 = vadd.f32 1e-06, %v1983_v19 }
  0x4f   :  { %v77_v17 = vsub.f32 0.0, %v76_v20  ;;  %v96_v18 = vadd.f32 %v95_v2, %v94_v1 }
  0x51   :  { %v78_v21 = vsel %vm29_vm2, %v77_v17, 0.0  ;;  %v97_v22 = vrot.slane %v96_v18, 4 }
  0x52   :  { %v80_v23 = vsel %vm79_vm3, %v78_v21, 0.0 }
  0x53   :  { %81 = vadd.xlane.f32.xlu0 %v80_v23  ;;  %v98_v0 = vadd.f32 %v97_v22, %v96_v18 }
  0x55   :  { %v99_v24 = vrot.slane %v98_v0, 2 }
  0x57   :  { %v100_v25 = vadd.f32 %v99_v24, %v98_v0 }
  0x59   :  { %v101_v26 = vrot.slane %v100_v25, 1 }
  0x5b   :  { %v102_v27 = vadd.f32 %v101_v26, %v100_v25 }
  0x5d   :  { %1984 = vrcp.f32 %v102_v27 }
  0x67   :  { %v1985_v28 = vpop.eup %1984 }
  0x68   :  { %v2236_v29 = vmul.f32 %v1985_v28, %v94_v1  ;;  %v2238_v30 = vmul.f32 %v1985_v28, %v95_v2 }
  0x6a   :  { %v118_v31 = vadd.f32 1e-06, %v2236_v29  ;;  %v119_v32 = vadd.f32 1e-06, %v2238_v30 }
  0x6c   :  { %1986 = vlog2.f32 %v118_v31 }
  0x6d   :  { %1988 = vlog2.f32 %v119_v32 }
  0x76   :  { %v1987_v33 = vpop.eup %1986 }
  0x77   :  { %v1989_v34 = vpop.eup %1988  ;;  %v2242_v35 = vmul.f32 0.6931472, %v1987_v33 }
  0x78   :  { %v2244_v36 = vmul.f32 0.6931472, %v1989_v34 }
  0xe0   :  { %v82_v37 = vpop.xlane.xlu0 %81 }
  0xe1   :  { %v83_v38 = vrot.slane %v82_v37, 4 }
  0xe3   :  { %v84_v39 = vadd.f32 %v83_v38, %v82_v37 }
  0xe5   :  { %v85_v40 = vrot.slane %v84_v39, 2 }
  0xe7   :  { %v86_v43 = vadd.f32 %v85_v40, %v84_v39 }
  0xe9   :  { %v87_v44 = vrot.slane %v86_v43, 1 }
  0xeb   :  { %v88_v45 = vadd.f32 %v87_v44, %v86_v43 }
  0xed   :  { %1931 = vpush %v88_v45 }
 0x11e   :  { %s2246_s1 = spop %1931 }
 0x11f LB: > { %vm156_vm4 = vcmask 130048   ;;  %v143_v48 = vmax.f32 %v2134_v47, %v2130_v46  ;;  %s1148_s2 = sadd.s32 5, %s2138_s2   ;;  %s2138_s2 = sphi %s2252_s2, %s1148_s2   ;;  %v2134_v47 = vphi %v2250_v47, %v2452_v47   ;;  %v2130_v46 = vphi %v2248_v46, %v2451_v46  }
 0x120   : > { %1781 = vmatprep.mubr.msk.f32.mxu0 %vm156_vm4, %v2189_v5  ;;  %1788 = vmatprep.mubr.msk.f32.mxu1 %vm156_vm4, %v2189_v5  ;;  %p137_p3 = scmp.lt.s32.totalorder %s1148_s2, 100 }
 0x121   : > { %v144_v49 = vrot.slane %v143_v48, 4 }
 0x123   : > { %v145_v50 = vmax.f32 %v143_v48, %v144_v49 }
 0x125   : > { %v146_v53 = vrot.slane %v145_v50, 2 }
 0x127   : > { %v147_v54 = vmax.f32 %v145_v50, %v146_v53 }
 0x129   : > { %v148_v55 = vrot.slane %v147_v54, 1 }
 0x12b   : > { %v149_v56 = vmax.f32 %v147_v54, %v148_v55 }
 0x12d   : > { %v150_v57 = vsub.f32 %v2134_v47, %v149_v56  ;;  %v151_v58 = vsub.f32 %v2130_v46, %v149_v56 }
 0x12f   : > { %v152_v59 = vmul.f32 1.442695, %v150_v57  ;;  %v154_v60 = vmul.f32 1.442695, %v151_v58 }
 0x131   : > { %1990 = vpow2.f32 %v152_v59 }
 0x132   : > { %1992 = vpow2.f32 %v154_v60 }
 0x13b   : > { %v1991_v61 = vpop.eup %1990 }
 0x13c   : > { %v1993_v62 = vpop.eup %1992 }
 0x13d   : > { %v1875_v63 = vpack.c.bf16 %v1993_v62, %v1991_v61 }
 0x13f   : > { %1876 = vmatprep.subr.bf16.mxu0 %v1875_v63 }
 0x140   : > { %1878 = vmatpush3.bf16.msra.mxu0 %v1875_v63 }
 0x143   : > { %1782 = vmatmul.mubr.msk.f32.vlgmr.msra.gmra.mrb[0].mxu0 %vm156_vm4, %v2204_v9 }
 0x144   : > { %1795 = vmatprep.mubr.msk.f32.mxu0 %vm156_vm4, %v2189_v5 }
 0x216   : > { %v1783_v7 = vpop.f32.mrb[0].mxu0 }
 0x217   : > { %1994 = vlog2.f32 %v1783_v7  ;;  %v229_v11 = vpop.f32.mrb[1].mxu0 }
 0x218   : > { %1996 = vlog2.f32 %v229_v11 }
 0x221   : > { %v1995_v12 = vpop.eup %1994 }
 0x222   : > { %v1997_v14 = vpop.eup %1996  ;;  %v241_v15 = vmul.f32 0.6931472, %v1995_v12 }
 0x223   : > { %v239_v19 = vmul.f32 0.6931472, %v1997_v14 }
 0x224   : > { %v243_v1 = vadd.f32 %v241_v15, %v149_v56 }
 0x225   : > { %v242_v20 = vadd.f32 %v239_v19, %v149_v56 }
 0x226   : > { %v245_v2 = vsub.f32 %v2244_v36, %v243_v1 }
 0x227   : > { %v244_v17 = vsub.f32 %v2242_v35, %v242_v20 }
 0x229   : > { %v246_v18 = vmax.f32 %v244_v17, %v245_v2 }
 0x22b   : > { %v247_v21 = vrot.slane %v246_v18, 4 }
 0x22d   : > { %v248_v22 = vmax.f32 %v246_v18, %v247_v21 }
 0x22f   : > { %v249_v23 = vrot.slane %v248_v22, 2 }
 0x231   : > { %v250_v0 = vmax.f32 %v248_v22, %v249_v23 }
 0x233   : > { %v251_v24 = vrot.slane %v250_v0, 1 }
 0x235   : > { %v252_v25 = vmax.f32 %v250_v0, %v251_v24 }
 0x237   : > { %v253_v26 = vsub.f32 %v244_v17, %v252_v25  ;;  %v254_v27 = vsub.f32 %v245_v2, %v252_v25 }
 0x239   : > { %v255_v28 = vmul.f32 1.442695, %v253_v26  ;;  %v257_v31 = vmul.f32 1.442695, %v254_v27 }
 0x23b   : > { %1998 = vpow2.f32 %v255_v28 }
 0x23c   : > { %2000 = vpow2.f32 %v257_v31 }
 0x245   : > { %v1999_v32 = vpop.eup %1998 }
 0x246   : > { %v2001_v33 = vpop.eup %2000 }
 0x247   : > { %v1879_v34 = vpack.c.bf16 %v2001_v33, %v1999_v32 }
 0x249   : > { %1880 = vmatprep.subr.bf16.mxu1 %v1879_v34 }
 0x24a   : > { %1882 = vmatpush3.bf16.msra.mxu1 %v1879_v34 }
 0x24d   : > { %1789 = vmatmul.mubr.msk.f32.vlgmr.msra.gmra.mrb[0].mxu1 %vm156_vm4, %v2204_v9 }
 0x24e   : > { %1802 = vmatprep.mubr.msk.f32.mxu1 %vm156_vm4, %v2189_v5 }
 0x320   : > { %v1790_v37 = vpop.f32.mrb[0].mxu1 }
 0x321   : > { %2002 = vlog2.f32 %v1790_v37  ;;  %v325_v38 = vpop.f32.mrb[1].mxu1 }
 0x322   : > { %2004 = vlog2.f32 %v325_v38 }
 0x32b   : > { %v2003_v39 = vpop.eup %2002 }
 0x32c   : > { %v2005_v40 = vpop.eup %2004  ;;  %v337_v43 = vmul.f32 0.6931472, %v2003_v39 }
 0x32d   : > { %v335_v44 = vmul.f32 0.6931472, %v2005_v40 }
 0x32e   : > { %v339_v45 = vadd.f32 %v337_v43, %v252_v25 }
 0x32f   : > { %v338_v46 = vadd.f32 %v335_v44, %v252_v25 }
 0x330   : > { %v341_v47 = vsub.f32 %v2225_v52, %v339_v45 }
 0x331   : > { %v340_v48 = vsub.f32 %v2223_v51, %v338_v46 }
 0x333   : > { %v342_v49 = vmax.f32 %v340_v48, %v341_v47 }
 0x335   : > { %v343_v50 = vrot.slane %v342_v49, 4 }
 0x337   : > { %v344_v53 = vmax.f32 %v342_v49, %v343_v50 }
 0x339   : > { %v345_v54 = vrot.slane %v344_v53, 2 }
 0x33b   : > { %v346_v55 = vmax.f32 %v344_v53, %v345_v54 }
 0x33d   : > { %v347_v56 = vrot.slane %v346_v55, 1 }
 0x33f   : > { %v348_v57 = vmax.f32 %v346_v55, %v347_v56 }
 0x341   : > { %v349_v58 = vsub.f32 %v340_v48, %v348_v57  ;;  %v350_v59 = vsub.f32 %v341_v47, %v348_v57 }
 0x343   : > { %v351_v60 = vmul.f32 1.442695, %v349_v58  ;;  %v353_v61 = vmul.f32 1.442695, %v350_v59 }
 0x345   : > { %2006 = vpow2.f32 %v351_v60 }
 0x346   : > { %2008 = vpow2.f32 %v353_v61 }
 0x34f   : > { %v2007_v62 = vpop.eup %2006 }
 0x350   : > { %v2009_v63 = vpop.eup %2008 }
 0x351   : > { %v1883_v7 = vpack.c.bf16 %v2009_v63, %v2007_v62 }
 0x353   : > { %1884 = vmatprep.subr.bf16.mxu0 %v1883_v7 }
 0x354   : > { %1886 = vmatpush3.bf16.msra.mxu0 %v1883_v7 }
 0x357   : > { %1796 = vmatmul.mubr.msk.f32.vlgmr.msra.gmra.mrb[2].mxu0 %vm156_vm4, %v2204_v9 }
 0x358   : > { %1809 = vmatprep.mubr.msk.f32.mxu0 %vm156_vm4, %v2189_v5 }
 0x42a   : > { %v1797_v11 = vpop.f32.mrb[2].mxu0 }
 0x42b   : > { %2010 = vlog2.f32 %v1797_v11  ;;  %v421_v12 = vpop.f32.mrb[3].mxu0 }
 0x42c   : > { %2012 = vlog2.f32 %v421_v12 }
 0x435   : > { %v2011_v14 = vpop.eup %2010 }
 0x436   : > { %v2013_v15 = vpop.eup %2012  ;;  %v433_v19 = vmul.f32 0.6931472, %v2011_v14 }
 0x437   : > { %v431_v1 = vmul.f32 0.6931472, %v2013_v15 }
 0x438   : > { %v435_v20 = vadd.f32 %v433_v19, %v348_v57 }
 0x439   : > { %v434_v2 = vadd.f32 %v431_v1, %v348_v57 }
 0x43a   : > { %v437_v17 = vsub.f32 %v2244_v36, %v435_v20 }
 0x43b   : > { %v436_v18 = vsub.f32 %v2242_v35, %v434_v2 }
 0x43d   : > { %v438_v21 = vmax.f32 %v436_v18, %v437_v17 }
 0x43f   : > { %v439_v22 = vrot.slane %v438_v21, 4 }
 0x441   : > { %v440_v23 = vmax.f32 %v438_v21, %v439_v22 }
 0x443   : > { %v441_v0 = vrot.slane %v440_v23, 2 }
 0x445   : > { %v442_v24 = vmax.f32 %v440_v23, %v441_v0 }
 0x447   : > { %v443_v25 = vrot.slane %v442_v24, 1 }
 0x449   : > { %v444_v26 = vmax.f32 %v442_v24, %v443_v25 }
 0x44b   : > { %v445_v27 = vsub.f32 %v436_v18, %v444_v26  ;;  %v446_v28 = vsub.f32 %v437_v17, %v444_v26 }
 0x44d   : > { %v447_v31 = vmul.f32 1.442695, %v445_v27  ;;  %v449_v32 = vmul.f32 1.442695, %v446_v28 }
 0x44f   : > { %2014 = vpow2.f32 %v447_v31 }
 0x450   : > { %2016 = vpow2.f32 %v449_v32 }
 0x459   : > { %v2015_v33 = vpop.eup %2014 }
 0x45a   : > { %v2017_v34 = vpop.eup %2016 }
 0x45b   : > { %v1887_v37 = vpack.c.bf16 %v2017_v34, %v2015_v33 }
 0x45d   : > { %1888 = vmatprep.subr.bf16.mxu1 %v1887_v37 }
 0x45e   : > { %1890 = vmatpush3.bf16.msra.mxu1 %v1887_v37 }
 0x461   : > { %1803 = vmatmul.mubr.msk.f32.vlgmr.msra.gmra.mrb[2].mxu1 %vm156_vm4, %v2204_v9 }
 0x462   : > { %1816 = vmatprep.mubr.msk.f32.mxu1 %vm156_vm4, %v2189_v5 }
 0x534   : > { %v1804_v38 = vpop.f32.mrb[2].mxu1 }
 0x535   : > { %2018 = vlog2.f32 %v1804_v38  ;;  %v517_v39 = vpop.f32.mrb[3].mxu1 }
 0x536   : > { %2020 = vlog2.f32 %v517_v39 }
 0x53f   : > { %v2019_v40 = vpop.eup %2018 }
 0x540   : > { %v2021_v43 = vpop.eup %2020  ;;  %v529_v44 = vmul.f32 0.6931472, %v2019_v40 }
 0x541   : > { %v527_v45 = vmul.f32 0.6931472, %v2021_v43 }
 0x542   : > { %v531_v46 = vadd.f32 %v529_v44, %v444_v26 }
 0x543   : > { %v530_v47 = vadd.f32 %v527_v45, %v444_v26 }
 0x544   : > { %v533_v48 = vsub.f32 %v2225_v52, %v531_v46 }
 0x545   : > { %v532_v49 = vsub.f32 %v2223_v51, %v530_v47 }
 0x547   : > { %v534_v50 = vmax.f32 %v532_v49, %v533_v48 }
 0x549   : > { %v535_v53 = vrot.slane %v534_v50, 4 }
 0x54b   : > { %v536_v54 = vmax.f32 %v534_v50, %v535_v53 }
 0x54d   : > { %v537_v55 = vrot.slane %v536_v54, 2 }
 0x54f   : > { %v538_v56 = vmax.f32 %v536_v54, %v537_v55 }
 0x551   : > { %v539_v57 = vrot.slane %v538_v56, 1 }
 0x553   : > { %v540_v58 = vmax.f32 %v538_v56, %v539_v57 }
 0x555   : > { %v541_v59 = vsub.f32 %v532_v49, %v540_v58  ;;  %v542_v60 = vsub.f32 %v533_v48, %v540_v58 }
 0x557   : > { %v543_v61 = vmul.f32 1.442695, %v541_v59  ;;  %v545_v62 = vmul.f32 1.442695, %v542_v60 }
 0x559   : > { %2022 = vpow2.f32 %v543_v61 }
 0x55a   : > { %2024 = vpow2.f32 %v545_v62 }
 0x563   : > { %v2023_v63 = vpop.eup %2022 }
 0x564   : > { %v2025_v7 = vpop.eup %2024 }
 0x565   : > { %v1891_v11 = vpack.c.bf16 %v2025_v7, %v2023_v63 }
 0x567   : > { %1892 = vmatprep.subr.bf16.mxu0 %v1891_v11 }
 0x568   : > { %1894 = vmatpush3.bf16.msra.mxu0 %v1891_v11 }
 0x56b   : > { %1810 = vmatmul.mubr.msk.f32.vlgmr.msra.gmra.mrb[4].mxu0 %vm156_vm4, %v2204_v9 }
 0x56c   : > { %1823 = vmatprep.mubr.msk.f32.mxu0 %vm156_vm4, %v2189_v5 }
 0x63e   : > { %v1811_v12 = vpop.f32.mrb[4].mxu0 }
 0x63f   : > { %2026 = vlog2.f32 %v1811_v12  ;;  %v613_v14 = vpop.f32.mrb[5].mxu0 }
 0x640   : > { %2028 = vlog2.f32 %v613_v14 }
 0x649   : > { %v2027_v15 = vpop.eup %2026 }
 0x64a   : > { %v2029_v19 = vpop.eup %2028  ;;  %v625_v1 = vmul.f32 0.6931472, %v2027_v15 }
 0x64b   : > { %v623_v20 = vmul.f32 0.6931472, %v2029_v19 }
 0x64c   : > { %v627_v2 = vadd.f32 %v625_v1, %v540_v58 }
 0x64d   : > { %v626_v17 = vadd.f32 %v623_v20, %v540_v58 }
 0x64e   : > { %v629_v18 = vsub.f32 %v2244_v36, %v627_v2 }
 0x64f   : > { %v628_v21 = vsub.f32 %v2242_v35, %v626_v17 }
 0x651   : > { %v630_v22 = vmax.f32 %v628_v21, %v629_v18 }
 0x653   : > { %v631_v23 = vrot.slane %v630_v22, 4 }
 0x655   : > { %v632_v0 = vmax.f32 %v630_v22, %v631_v23 }
 0x657   : > { %v633_v24 = vrot.slane %v632_v0, 2 }
 0x659   : > { %v634_v25 = vmax.f32 %v632_v0, %v633_v24 }
 0x65b   : > { %v635_v26 = vrot.slane %v634_v25, 1 }
 0x65d   : > { %v636_v27 = vmax.f32 %v634_v25, %v635_v26 }
 0x65f   : > { %v637_v28 = vsub.f32 %v628_v21, %v636_v27  ;;  %v638_v31 = vsub.f32 %v629_v18, %v636_v27 }
 0x661   : > { %v639_v32 = vmul.f32 1.442695, %v637_v28  ;;  %v641_v33 = vmul.f32 1.442695, %v638_v31 }
 0x663   : > { %2030 = vpow2.f32 %v639_v32 }
 0x664   : > { %2032 = vpow2.f32 %v641_v33 }
 0x66d   : > { %v2031_v34 = vpop.eup %2030 }
 0x66e   : > { %v2033_v37 = vpop.eup %2032 }
 0x66f   : > { %v1895_v38 = vpack.c.bf16 %v2033_v37, %v2031_v34 }
 0x671   : > { %1896 = vmatprep.subr.bf16.mxu1 %v1895_v38 }
 0x672   : > { %1898 = vmatpush3.bf16.msra.mxu1 %v1895_v38 }
 0x675   : > { %1817 = vmatmul.mubr.msk.f32.vlgmr.msra.gmra.mrb[4].mxu1 %vm156_vm4, %v2204_v9 }
 0x676   : > { %1830 = vmatprep.mubr.msk.f32.mxu1 %vm156_vm4, %v2189_v5 }
 0x748   : > { %v1818_v39 = vpop.f32.mrb[4].mxu1 }
 0x749   : > { %2034 = vlog2.f32 %v1818_v39  ;;  %v709_v40 = vpop.f32.mrb[5].mxu1 }
 0x74a   : > { %2036 = vlog2.f32 %v709_v40 }
 0x753   : > { %v2035_v43 = vpop.eup %2034 }
 0x754   : > { %v2037_v44 = vpop.eup %2036  ;;  %v721_v45 = vmul.f32 0.6931472, %v2035_v43 }
 0x755   : > { %v719_v46 = vmul.f32 0.6931472, %v2037_v44 }
 0x756   : > { %v723_v47 = vadd.f32 %v721_v45, %v636_v27 }
 0x757   : > { %v722_v48 = vadd.f32 %v719_v46, %v636_v27 }
 0x758   : > { %v725_v49 = vsub.f32 %v2225_v52, %v723_v47 }
 0x759   : > { %v724_v50 = vsub.f32 %v2223_v51, %v722_v48 }
 0x75b   : > { %v726_v53 = vmax.f32 %v724_v50, %v725_v49 }
 0x75d   : > { %v727_v54 = vrot.slane %v726_v53, 4 }
 0x75f   : > { %v728_v55 = vmax.f32 %v726_v53, %v727_v54 }
 0x761   : > { %v729_v56 = vrot.slane %v728_v55, 2 }
 0x763   : > { %v730_v57 = vmax.f32 %v728_v55, %v729_v56 }
 0x765   : > { %v731_v58 = vrot.slane %v730_v57, 1 }
 0x767   : > { %v732_v59 = vmax.f32 %v730_v57, %v731_v58 }
 0x769   : > { %v733_v60 = vsub.f32 %v724_v50, %v732_v59  ;;  %v734_v61 = vsub.f32 %v725_v49, %v732_v59 }
 0x76b   : > { %v735_v62 = vmul.f32 1.442695, %v733_v60  ;;  %v737_v63 = vmul.f32 1.442695, %v734_v61 }
 0x76d   : > { %2038 = vpow2.f32 %v735_v62 }
 0x76e   : > { %2040 = vpow2.f32 %v737_v63 }
 0x777   : > { %v2039_v7 = vpop.eup %2038 }
 0x778   : > { %v2041_v11 = vpop.eup %2040 }
 0x779   : > { %v1899_v12 = vpack.c.bf16 %v2041_v11, %v2039_v7 }
 0x77b   : > { %1900 = vmatprep.subr.bf16.mxu0 %v1899_v12 }
 0x77c   : > { %1902 = vmatpush3.bf16.msra.mxu0 %v1899_v12 }
 0x77f   : > { %1824 = vmatmul.mubr.msk.f32.vlgmr.msra.gmra.mrb[6].mxu0 %vm156_vm4, %v2204_v9 }
 0x780   : > { %1837 = vmatprep.mubr.msk.f32.mxu0 %vm156_vm4, %v2189_v5 }
 0x852   : > { %v1825_v14 = vpop.f32.mrb[6].mxu0 }
 0x853   : > { %2042 = vlog2.f32 %v1825_v14  ;;  %v805_v15 = vpop.f32.mrb[7].mxu0 }
 0x854   : > { %2044 = vlog2.f32 %v805_v15 }
 0x85d   : > { %v2043_v19 = vpop.eup %2042 }
 0x85e   : > { %v2045_v1 = vpop.eup %2044  ;;  %v817_v20 = vmul.f32 0.6931472, %v2043_v19 }
 0x85f   : > { %v815_v2 = vmul.f32 0.6931472, %v2045_v1 }
 0x860   : > { %v819_v17 = vadd.f32 %v817_v20, %v732_v59 }
 0x861   : > { %v818_v18 = vadd.f32 %v815_v2, %v732_v59 }
 0x862   : > { %v2304_v21 = vsub.f32 %v2244_v36, %v819_v17 }
 0x863   : > { %v2307_v22 = vsub.f32 %v2242_v35, %v818_v18 }
 0x865   : > { %v822_v23 = vmax.f32 %v2307_v22, %v2304_v21 }
 0x867   : > { %v823_v0 = vrot.slane %v822_v23, 4 }
 0x869   : > { %v824_v24 = vmax.f32 %v822_v23, %v823_v0 }
 0x86b   : > { %v825_v25 = vrot.slane %v824_v24, 2 }
 0x86d   : > { %v826_v26 = vmax.f32 %v824_v24, %v825_v25 }
 0x86f   : > { %v827_v27 = vrot.slane %v826_v26, 1 }
 0x871   : > { %v828_v28 = vmax.f32 %v826_v26, %v827_v27 }
 0x873   : > { %v829_v31 = vsub.f32 %v2307_v22, %v828_v28  ;;  %v830_v32 = vsub.f32 %v2304_v21, %v828_v28 }
 0x875   : > { %v831_v33 = vmul.f32 1.442695, %v829_v31  ;;  %v833_v34 = vmul.f32 1.442695, %v830_v32 }
 0x877   : > { %2046 = vpow2.f32 %v831_v33 }
 0x878   : > { %2048 = vpow2.f32 %v833_v34 }
 0x881   : > { %v2047_v37 = vpop.eup %2046 }
 0x882   : > { %v2049_v38 = vpop.eup %2048 }
 0x883   : > { %v1903_v39 = vpack.c.bf16 %v2049_v38, %v2047_v37 }
 0x885   : > { %1904 = vmatprep.subr.bf16.mxu1 %v1903_v39 }
 0x886   : > { %1906 = vmatpush3.bf16.msra.mxu1 %v1903_v39 }
 0x889   : > { %1831 = vmatmul.mubr.msk.f32.vlgmr.msra.gmra.mrb[6].mxu1 %vm156_vm4, %v2204_v9 }
 0x88a   : > { %1844 = vmatprep.mubr.msk.f32.mxu1 %vm156_vm4, %v2189_v5 }
 0x95c   : > { %v1832_v40 = vpop.f32.mrb[6].mxu1 }
 0x95d   : > { %2050 = vlog2.f32 %v1832_v40  ;;  %v901_v43 = vpop.f32.mrb[7].mxu1 }
 0x95e   : > { %2052 = vlog2.f32 %v901_v43 }
 0x967   : > { %v2051_v44 = vpop.eup %2050 }
 0x968   : > { %v2053_v45 = vpop.eup %2052  ;;  %v913_v46 = vmul.f32 0.6931472, %v2051_v44 }
 0x969   : > { %v911_v47 = vmul.f32 0.6931472, %v2053_v45 }
 0x96a   : > { %v915_v48 = vadd.f32 %v913_v46, %v828_v28 }
 0x96b   : > { %v914_v49 = vadd.f32 %v911_v47, %v828_v28 }
 0x96c   : > { %v2318_v50 = vsub.f32 %v2225_v52, %v915_v48 }
 0x96d   : > { %v2321_v53 = vsub.f32 %v2223_v51, %v914_v49 }
 0x96f   : > { %v918_v54 = vmax.f32 %v2321_v53, %v2318_v50 }
 0x971   : > { %v919_v55 = vrot.slane %v918_v54, 4 }
 0x973   : > { %v920_v56 = vmax.f32 %v918_v54, %v919_v55 }
 0x975   : > { %v921_v57 = vrot.slane %v920_v56, 2 }
 0x977   : > { %v922_v58 = vmax.f32 %v920_v56, %v921_v57 }
 0x979   : > { %v923_v59 = vrot.slane %v922_v58, 1 }
 0x97b   : > { %v924_v60 = vmax.f32 %v922_v58, %v923_v59 }
 0x97d   : > { %v925_v61 = vsub.f32 %v2321_v53, %v924_v60  ;;  %v926_v62 = vsub.f32 %v2318_v50, %v924_v60 }
 0x97f   : > { %v927_v63 = vmul.f32 1.442695, %v925_v61  ;;  %v929_v7 = vmul.f32 1.442695, %v926_v62 }
 0x981   : > { %2054 = vpow2.f32 %v927_v63 }
 0x982   : > { %2056 = vpow2.f32 %v929_v7 }
 0x98b   : > { %v2055_v11 = vpop.eup %2054 }
 0x98c   : > { %v2057_v12 = vpop.eup %2056 }
 0x98d   : > { %v1907_v14 = vpack.c.bf16 %v2057_v12, %v2055_v11 }
 0x98f   : > { %1908 = vmatprep.subr.bf16.mxu0 %v1907_v14 }
 0x990   : > { %1910 = vmatpush3.bf16.msra.mxu0 %v1907_v14 }
 0x993   : > { %1838 = vmatmul.mubr.msk.f32.vlgmr.msra.gmra.mrb[8].mxu0 %vm156_vm4, %v2204_v9 }
 0xa66   : > { %v1839_v15 = vpop.f32.mrb[8].mxu0 }
 0xa67   : > { %2058 = vlog2.f32 %v1839_v15  ;;  %v997_v19 = vpop.f32.mrb[9].mxu0 }
 0xa68   : > { %2060 = vlog2.f32 %v997_v19 }
 0xa71   : > { %v2059_v1 = vpop.eup %2058 }
 0xa72   : > { %v2061_v20 = vpop.eup %2060  ;;  %v1009_v2 = vmul.f32 0.6931472, %v2059_v1 }
 0xa73   : > { %v1007_v17 = vmul.f32 0.6931472, %v2061_v20 }
 0xa74   : > { %v1011_v18 = vadd.f32 %v1009_v2, %v924_v60 }
 0xa75   : > { %v1010_v23 = vadd.f32 %v1007_v17, %v924_v60 }
 0xa76   : > { %v2330_v0 = vsub.f32 %v2244_v36, %v1011_v18 }
 0xa77   : > { %v2333_v24 = vsub.f32 %v2242_v35, %v1010_v23 }
 0xa78   : > { %v1111_v25 = vsub.f32 %v2330_v0, %v2304_v21 }
 0xa79   : > { %v1014_v26 = vmax.f32 %v2333_v24, %v2330_v0  ;;  %v1110_v27 = vsub.f32 %v2333_v24, %v2307_v22 }
 0xa7a   : > { %v1113_v28 = vand.u32 2147483647, %v1111_v25 }
 0xa7b   : > { %v1015_v31 = vrot.slane %v1014_v26, 4  ;;  %v1112_v32 = vand.u32 2147483647, %v1110_v27 }
 0xa7c   : > { %v1117_v33 = vsel %vm29_vm2, %v1113_v28, 0.0 }
 0xa7d   : > { %v1016_v34 = vmax.f32 %v1014_v26, %v1015_v31  ;;  %v1116_v37 = vsel %vm29_vm2, %v1112_v32, 0.0 }
 0xa7e   : > { %v1118_v38 = vmax.f32 %v1116_v37, %v1117_v33 }
 0xa7f   : > { %v1017_v39 = vrot.slane %v1016_v34, 2 }
 0xa80   : > { %1119 = vmax.xlane.f32.xlu0 %v1118_v38 }
 0xa81   : > { %v1018_v21 = vmax.f32 %v1016_v34, %v1017_v39 }
 0xa83   : > { %v1019_v40 = vrot.slane %v1018_v21, 1 }
 0xa85   : > { %v1020_v43 = vmax.f32 %v1018_v21, %v1019_v40 }
 0xa87   : > { %v1021_v44 = vsub.f32 %v2333_v24, %v1020_v43  ;;  %v1022_v22 = vsub.f32 %v2330_v0, %v1020_v43 }
 0xa89   : > { %v1023_v45 = vmul.f32 1.442695, %v1021_v44  ;;  %v1025_v46 = vmul.f32 1.442695, %v1022_v22 }
 0xa8b   : > { %2062 = vpow2.f32 %v1023_v45 }
 0xa8c   : > { %2064 = vpow2.f32 %v1025_v46 }
 0xa95   : > { %v2063_v47 = vpop.eup %2062 }
 0xa96   : > { %v2065_v48 = vpop.eup %2064 }
 0xa97   : > { %v1911_v49 = vpack.c.bf16 %v2065_v48, %v2063_v47 }
 0xa99   : > { %1912 = vmatprep.subr.bf16.mxu1 %v1911_v49 }
 0xa9a   : > { %1914 = vmatpush3.bf16.msra.mxu1 %v1911_v49 }
 0xa9d   : > { %1845 = vmatmul.mubr.msk.f32.vlgmr.msra.gmra.mrb[8].mxu1 %vm156_vm4, %v2204_v9 }
 0xb0d   : > { %v1120_v54 = vpop.xlane.xlu0 %1119 }
 0xb0e   : > { %v1121_v55 = vrot.slane %v1120_v54, 4 }
 0xb10   : > { %v1122_v56 = vmax.f32 %v1120_v54, %v1121_v55 }
 0xb12   : > { %v1123_v57 = vrot.slane %v1122_v56, 2 }
 0xb14   : > { %v1124_v58 = vmax.f32 %v1122_v56, %v1123_v57 }
 0xb16   : > { %v1125_v59 = vrot.slane %v1124_v58, 1 }
 0xb18   : > { %v1126_v60 = vmax.f32 %v1124_v58, %v1125_v59 }
 0xb1a   : > { %1933 = vpush %v1126_v60 }
 0xb4b   : > { %s1934_s3 = spop %1933 }
 0xb4c   : > { %p1144_p0 = scmp.lt.f32.partialorder %s1934_s3, 0.0001 }
 0xb70   : > { %v1846_v61 = vpop.f32.mrb[8].mxu1 }
 0xb71   : > { %2066 = vlog2.f32 %v1846_v61  ;;  %v1093_v62 = vpop.f32.mrb[9].mxu1 }
 0xb72   : > { %2068 = vlog2.f32 %v1093_v62 }
 0xb7b   : > { %v2067_v63 = vpop.eup %2066 }
 0xb7c   : > { %v2069_v7 = vpop.eup %2068  ;;  %v1105_v11 = vmul.f32 0.6931472, %v2067_v63 }
 0xb7d   : > { %v1103_v12 = vmul.f32 0.6931472, %v2069_v7 }
 0xb7e   : > { %v1107_v14 = vadd.f32 %v1105_v11, %v1020_v43 }
 0xb7f   : > { %v1106_v15 = vadd.f32 %v1103_v12, %v1020_v43 }
 0xb80   : > { %v2350_v46 = vsub.f32 %v2225_v52, %v1107_v14  }
 0xb81   : > { %v2353_v47 = vsub.f32 %v2223_v51, %v1106_v15  }
 0xb82   : > { %v2449_v19 = vmov %v2350_v46 }
 0xb83   : > { %v2450_v1 = vmov %v2353_v47  ;;  %v1129_v20 = vsub.f32 %v2449_v19, %v2318_v50  ;;  %v2451_v46 = vmov %v2449_v19 }
 0xb84   : > { %v1128_v2 = vsub.f32 %v2450_v1, %v2321_v53  ;;  %v2452_v47 = vmov %v2450_v1 }
 0xb85   : > { %v1131_v17 = vand.u32 2147483647, %v1129_v20 }
 0xb86   : > { %v1130_v18 = vand.u32 2147483647, %v1128_v2 }
 0xb87   : > { %v1133_v23 = vsel %vm29_vm2, %v1131_v17, 0.0 }
 0xb88   : > { %v1132_v25 = vsel %vm29_vm2, %v1130_v18, 0.0 }
 0xb89   : > { %v1134_v26 = vmax.f32 %v1132_v25, %v1133_v23 }
 0xb8b   : > { %1135 = vmax.xlane.f32.xlu0 %v1134_v26 }
 0xc18   : > { %v1136_v27 = vpop.xlane.xlu0 %1135 }
 0xc19   : > { %v1137_v28 = vrot.slane %v1136_v27, 4 }
 0xc1b   : > { %v1138_v31 = vmax.f32 %v1136_v27, %v1137_v28 }
 0xc1d   : > { %v1139_v32 = vrot.slane %v1138_v31, 2 }
 0xc1f   : > { %v1140_v33 = vmax.f32 %v1138_v31, %v1139_v32 }
 0xc21   : > { %v1141_v50 = vrot.slane %v1140_v33, 1 }
 0xc23   : > { %v1142_v34 = vmax.f32 %v1140_v33, %v1141_v50 }
 0xc25   : > { %1935 = vpush %v1142_v34 }
 0xc56   : > { %s1936_s28 = spop %1935 }
 0xc57   : > { %p1145_p1 = scmp.lt.f32.partialorder %s1936_s28, 0.0001 }
 0xc59   : > { %p1146_p2 = pnand %p1145_p1, %p1144_p0 }
 0xc5b   : > { %p139_p4 = pnand %p1146_p2, %p137_p3 }
 0xc5c   :  { %v1152_v53 = vmax.f32 (%p139_p4), %v2450_v1, %v2449_v19  ;;  %1851 = vmatprep.mubr.msk.f32.mxu0 (%p139_p4), %vm156_vm4, %v2189_v5  ;;  %1858 = vmatprep.mubr.msk.f32.mxu1 (%p139_p4), %vm156_vm4, %v2189_v5  ;;  %v1150_v46 = vmul.f32 (%p139_p4), %v2189_v5, %v2179_v3  ;;  %vm1648_vm13 = vcmp.eq.s32.totalorder (%p139_p4), %v2192_v6, 0  ;;  %vm1655_vm14 = vcmp.eq.s32.totalorder (%p139_p4), %v2230_v13, 3 }
 0xc5d   :  { %142 = sbr.rel (!%p139_p4) target bundleno = 287 (0x11f), region = 43  ;;  %vm1653_vm15 = vcmp.eq.s32.totalorder (%p139_p4), %v2230_v13, 2  ;;  %vm1651_vm0 = vcmp.eq.s32.totalorder (%p139_p4), %v2230_v13, 1  ;;  %vm1656_vm1 = vmand (%p139_p4), %vm1648_vm13, %vm1655_vm14 }
 0xc5e   :  { %v1153_v37 = vrot.slane (%p139_p4), %v1152_v53, 4 }
 0xc60   :  { %v1154_v38 = vmax.f32 (%p139_p4), %v1152_v53, %v1153_v37 }
 0xc62   :  { %v1155_v39 = vrot.slane (%p139_p4), %v1154_v38, 2 }
 0xc64   :  { %v1156_v21 = vmax.f32 %v1154_v38, %v1155_v39 }
 0xc66   :  { %v1157_v40 = vrot.slane %v1156_v21, 1 }
 0xc68   :  { %v1158_v43 = vmax.f32 %v1156_v21, %v1157_v40 }
 0xc6a   :  { %v1159_v44 = vsub.f32 %v2450_v1, %v1158_v43  ;;  %v1160_v22 = vsub.f32 %v2449_v19, %v1158_v43 }
 0xc6c   :  { %v1161_v45 = vmul.f32 1.442695, %v1159_v44  ;;  %v1163_v51 = vmul.f32 1.442695, %v1160_v22 }
 0xc6e   :  { %2070 = vpow2.f32 %v1161_v45 }
 0xc6f   :  { %2072 = vpow2.f32 %v1163_v51 }
 0xc78   :  { %v2071_v52 = vpop.eup %2070 }
 0xc79   :  { %v2073_v35 = vpop.eup %2072 }
 0xc7a   :  { %v1915_v36 = vpack.c.bf16 %v2073_v35, %v2071_v52 }
 0xc7c   :  { %1916 = vmatprep.subr.bf16.mxu0 %v1915_v36 }
 0xc7d   :  { %1918 = vmatpush3.bf16.msra.mxu0 %v1915_v36 }
 0xc80   :  { %1852 = vmatmul.mubr.msk.f32.vlgmr.msra.gmra.mrb[0].mxu0 %vm156_vm4, %v2204_v9 }
 0xc81   :  { %1865 = vmatprep.mubr.msk.f32.mxu0 %vm156_vm4, %v1150_v46 }
 0xd53   :  { %v1853_v47 = vpop.f32.mrb[0].mxu0 }
 0xd54   :  { %2074 = vlog2.f32 %v1853_v47  ;;  %v1238_v48 = vpop.f32.mrb[1].mxu0 }
 0xd55   :  { %2076 = vlog2.f32 %v1238_v48 }
 0xd5e   :  { %v2075_v49 = vpop.eup %2074 }
 0xd5f   :  { %v2077_v54 = vpop.eup %2076  ;;  %v1250_v55 = vmul.f32 0.6931472, %v2075_v49 }
 0xd60   :  { %v1248_v56 = vmul.f32 0.6931472, %v2077_v54 }
 0xd61   :  { %v1252_v57 = vadd.f32 %v1250_v55, %v1158_v43 }
 0xd62   :  { %v1251_v58 = vadd.f32 %v1248_v56, %v1158_v43 }
 0xd63   :  { %v1254_v59 = vadd.f32 %v1252_v57, %v2330_v0 }
 0xd64   :  { %v1253_v60 = vadd.f32 %v1251_v58, %v2333_v24 }
 0xd65   :  { %v1257_v61 = vmul.f32 1.442695, %v1254_v59 }
 0xd66   :  { %v1255_v62 = vmul.f32 1.442695, %v1253_v60 }
 0xd67   :  { %2078 = vpow2.f32 %v1257_v61 }
 0xd68   :  { %2080 = vpow2.f32 %v1255_v62 }
 0xd71   :  { %v2079_v5 = vpop.eup %2078 }
 0xd72   :  { %v2081_v63 = vpop.eup %2080  ;;  %v1260_v7 = vadd.f32 1.6e-05, %v2079_v5  ;;  %v1610_v5 = vmax.f32 %v2236_v29, %v2238_v30 }
 0xd73   :  { %v1259_v11 = vadd.f32 1.6e-05, %v2081_v63 }
 0xd74   :  { %2082 = vrcp.f32 %v1260_v7 }
 0xd75   :  { %2084 = vrcp.f32 %v1259_v11  ;;  %v1611_v11 = vrot.slane %v1610_v5, 4 }
 0xd7e   :  { %v2083_v12 = vpop.eup %2082 }
 0xd7f   :  { %v2085_v14 = vpop.eup %2084  ;;  %v1264_v15 = vmul.f32 %v2083_v12, %v2238_v30 }
 0xd80   :  { %v1262_v20 = vmul.f32 %v2085_v14, %v2236_v29 }
 0xd81   :  { %2086 = vlog2.f32 %v1264_v15 }
 0xd82   :  { %2088 = vlog2.f32 %v1262_v20  ;;  %v1927_v2 = vpack.c.bf16 %v1264_v15, %v1262_v20  ;;  %v1371_v17 = vadd.f32 %v1264_v15, %v1262_v20  ;;  %v1612_v20 = vmax.f32 %v1610_v5, %v1611_v11 }
 0xd84   :  { %v1372_v36 = vrot.slane %v1371_v17, 4 }
 0xd86   :  { %v1373_v46 = vadd.f32 %v1372_v36, %v1371_v17 }
 0xd8b   :  { %v2087_v18 = vpop.eup %2086 }
 0xd8c   :  { %v2089_v23 = vpop.eup %2088  ;;  %v1268_v25 = vmul.f32 0.6931472, %v2087_v18 }
 0xd8d   :  { %v1266_v26 = vmul.f32 0.6931472, %v2089_v23 }
 0xd8e   :  { %v1270_v27 = vadd.f32 %v1268_v25, %v2330_v0 }
 0xd8f   :  { %v1269_v28 = vadd.f32 %v1266_v26, %v2333_v24  ;;  %v1151_v24 = vmul.f32 %v2204_v9, %v2184_v4 }
 0xd91   :  { %v1271_v31 = vmax.f32 %v1269_v28, %v1270_v27 }
 0xd93   :  { %v1272_v32 = vrot.slane %v1271_v31, 4 }
 0xd95   :  { %v1273_v33 = vmax.f32 %v1271_v31, %v1272_v32 }
 0xd97   :  { %v1274_v50 = vrot.slane %v1273_v33, 2 }
 0xd99   :  { %v1275_v34 = vmax.f32 %v1273_v33, %v1274_v50 }
 0xd9b   :  { %v1276_v53 = vrot.slane %v1275_v34, 1 }
 0xd9d   :  { %v2391_v37 = vmax.f32 %v1275_v34, %v1276_v53 }
 0xd9f   :  { %v1278_v38 = vsub.f32 %v1269_v28, %v2391_v37  ;;  %v1279_v39 = vsub.f32 %v1270_v27, %v2391_v37 }
 0xda1   :  { %v1280_v21 = vmul.f32 1.442695, %v1278_v38  ;;  %v1282_v40 = vmul.f32 1.442695, %v1279_v39 }
 0xda3   :  { %2090 = vpow2.f32 %v1280_v21 }
 0xda4   :  { %2092 = vpow2.f32 %v1282_v40 }
 0xdad   :  { %v2091_v43 = vpop.eup %2090 }
 0xdae   :  { %v2093_v0 = vpop.eup %2092 }
 0xdaf   :  { %v1919_v44 = vpack.c.bf16 %v2093_v0, %v2091_v43 }
 0xdb1   :  { %1920 = vmatprep.subr.bf16.mxu1 %v1919_v44  ;;  %1924 = vmatprep.subr.bf16.mxu0 %v1919_v44 }
 0xdb2   :  { %1922 = vmatpush3.bf16.msra.mxu1 %v1919_v44  ;;  %1926 = vmatpush3.bf16.msra.mxu0 %v1919_v44 }
 0xdb3   :  { %1928 = vmatprep.subr.bf16.mxu1 %v1927_v2 }
 0xdb5   :  { %1859 = vmatmul.mubr.msk.f32.vlgmr.msra.gmra.mrb[0].mxu1 %vm156_vm4, %v2204_v9  ;;  %1866 = vmatmul.mubr.msk.f32.vlgmr.msra.gmra.mrb[2].mxu0 %vm156_vm4, %v1151_v24 }
 0xdb6   :  { %1930 = vmatpush3.bf16.msra.mxu1 %v1927_v2  ;;  %1872 = vmatprep.mubr.msk.f32.mxu1 %vm156_vm4, %v2179_v3  ;;  %v1374_v3 = vrot.slane %v1373_v46, 2  ;;  %v1613_v2 = vrot.slane %v1612_v20, 2 }
 0xdb8   :  { %v1375_v58 = vadd.f32 %v1374_v3, %v1373_v46  ;;  %v1614_v17 = vmax.f32 %v1612_v20, %v1613_v2 }
 0xdb9   :  { %1873 = vmatmul.mubr.msk.f32.vlgmr.msra.gmra.mrb[2].mxu1 %vm156_vm4, %v2184_v4  ;;  %vm1652_vm4 = vmand %vm1648_vm13, %vm1651_vm0 }
 0xdba   :  { %v1376_v61 = vrot.slane %v1375_v58, 1  ;;  %v1615_v28 = vrot.slane %v1614_v17, 1 }
 0xdbc   :  { %v1377_v62 = vadd.f32 %v1376_v61, %v1375_v58  ;;  %v1616_v33 = vmax.f32 %v1614_v17, %v1615_v28 }
 0xdbe   :  { %v1378_v63 = vmul.f32 1e-06, %v1377_v62  ;;  %vm1617_vm5 = vcmp.eq.f32.partialorder %v2236_v29, %v1616_v33  ;;  %vm1618_vm6 = vcmp.eq.f32.partialorder %v2238_v30, %v1616_v33 }
 0xdbf   :  { %v1619_v38 = vsel %vm1617_vm5, %v2192_v6, 16 }
 0xe88   :  { %v1860_v22 = vpop.f32.mrb[0].mxu1  ;;  %v2404_v45 = vpop.f32.mrb[2].mxu0 }
 0xe89   :  { %2094 = vlog2.f32 %v1860_v22  ;;  %v1350_v51 = vpop.f32.mrb[1].mxu1  ;;  %v2406_v52 = vpop.f32.mrb[3].mxu0 }
 0xe8a   :  { %2096 = vlog2.f32 %v1350_v51 }
 0xe8c   :  { %v1874_v35 = vpop.f32.mrb[2].mxu1 }
 0xe8d   :  { %v1570_v9 = vpop.f32.mrb[3].mxu1 }
 0xe93   :  { %v2095_v47 = vpop.eup %2094 }
 0xe94   :  { %v2097_v48 = vpop.eup %2096  ;;  %v1362_v49 = vmul.f32 0.6931472, %v2095_v47 }
 0xe95   :  { %v1360_v54 = vmul.f32 0.6931472, %v2097_v48 }
 0xe96   :  { %v1364_v55 = vadd.f32 %v1362_v49, %v2391_v37 }
 0xe97   :  { %v1363_v4 = vadd.f32 %v1360_v54, %v2391_v37 }
 0xe98   :  { %v1366_v56 = vadd.f32 %v1364_v55, %v2449_v19 }
 0xe99   :  { %v1365_v57 = vadd.f32 %v1363_v4, %v2450_v1 }
 0xe9a   :  { %v1369_v59 = vmul.f32 1.442695, %v1366_v56 }
 0xe9b   :  { %v1367_v60 = vmul.f32 1.442695, %v1365_v57 }
 0xe9c   :  { %2098 = vpow2.f32 %v1369_v59 }
 0xe9d   :  { %2100 = vpow2.f32 %v1367_v60 }
 0xea6   :  { %v2099_v7 = vpop.eup %2098 }
 0xea7   :  { %v2101_v12 = vpop.eup %2100  ;;  %v1380_v14 = vadd.f32 %v2099_v7, %v1378_v63 }
 0xea8   :  { %v1379_v15 = vadd.f32 %v2101_v12, %v1378_v63 }
 0xea9   :  { %2102 = vrcp.f32 %v1380_v14 }
 0xeaa   :  { %2104 = vrcp.f32 %v1379_v15 }
 0xeb3   :  { %v2103_v18 = vpop.eup %2102 }
 0xeb4   :  { %v2105_v23 = vpop.eup %2104  ;;  %v1384_v25 = vmul.f32 %v2103_v18, %v2219_v42  ;;  %v1620_v42 = vsel %vm1618_vm6, %v2207_v10, 16 }
 0xeb5   :  { %v1382_v26 = vmul.f32 %v2105_v23, %v2217_v41  ;;  %vm1621_vm7 = vcmp.lt.s32.totalorder %v1619_v38, %v1620_v42 }
 0xeb6   :  { %2106 = vlog2.f32 %v1384_v25  ;;  %v1580_v27 = vmul.f32 %v1874_v35, %v1384_v25  ;;  %v1622_v43 = vsel %vm1621_vm7, %v1619_v38, %v1620_v42 }
 0xeb7   :  { %2108 = vlog2.f32 %v1382_v26  ;;  %v1579_v31 = vmul.f32 %v1570_v9, %v1382_v26  ;;  %v1623_v29 = vrot.slane %v1622_v43, 4 }
 0xeb9   :  { %v1581_v32 = vadd.f32 %v1580_v27, %v1579_v31  ;;  %vm1624_vm8 = vcmp.lt.s32.totalorder %v1622_v43, %v1623_v29 }
 0xeba   :  { %v1625_v51 = vsel %vm1624_vm8, %v1622_v43, %v1623_v29 }
 0xebb   :  { %v1626_v10 = vrot.slane %v1625_v51, 2 }
 0xebd   :  { %vm1627_vm9 = vcmp.lt.s32.totalorder %v1625_v51, %v1626_v10 }
 0xec0   :  { %v2107_v50 = vpop.eup %2106 }
 0xec1   :  { %v2109_v34 = vpop.eup %2108  ;;  %v1388_v53 = vmul.f32 0.6931472, %v2107_v50 }
 0xec2   :  { %v1386_v39 = vmul.f32 0.6931472, %v2109_v34 }
 0xec3   :  { %v1390_v41 = vadd.f32 %v1388_v53, %v2449_v19  ;;  %v1628_v19 = vsel %vm1627_vm9, %v1625_v51, %v1626_v10 }
 0xec4   :  { %v1389_v21 = vadd.f32 %v1386_v39, %v2450_v1  ;;  %v1582_v1 = vrot.slane %v1581_v32, 4  ;;  %v1629_v48 = vrot.slane %v1628_v19, 1 }
 0xec6   :  { %v1391_v40 = vmax.f32 %v1389_v21, %v1390_v41  ;;  %v1583_v49 = vadd.f32 %v1582_v1, %v1581_v32  ;;  %vm1630_vm10 = vcmp.lt.s32.totalorder %v1628_v19, %v1629_v48 }
 0xec7   :  { %v1631_v59 = vsel %vm1630_vm10, %v1628_v19, %v1629_v48 }
 0xec8   :  { %v1392_v0 = vrot.slane %v1391_v40, 4  ;;  %v1584_v56 = vrot.slane %v1583_v49, 2  ;;  %v1632_v5 = vsub.s32 %v1631_v59, %v2199_v8 }
 0xeca   :  { %v1393_v44 = vmax.f32 %v1391_v40, %v1392_v0  ;;  %v1585_v62 = vadd.f32 %v1584_v56, %v1583_v49 }
 0xecc   :  { %v1394_v24 = vrot.slane %v1393_v44, 2  ;;  %v1586_v11 = vrot.slane %v1585_v62, 1 }
 0xece   :  { %v1395_v30 = vmax.f32 %v1393_v44, %v1394_v24  ;;  %v1587_v15 = vadd.f32 %v1586_v11, %v1585_v62 }
 0xed0   :  { %v1396_v22 = vrot.slane %v1395_v30, 1 }
 0xed2   :  { %v1397_v35 = vmax.f32 %v1395_v30, %v1396_v22  ;;  %v1663_v30 = vstv %s2246_s1 }
 0xed4   :  { %v1398_v36 = vsub.f32 %v1389_v21, %v1397_v35  ;;  %v1399_v9 = vsub.f32 %v1390_v41, %v1397_v35  ;;  %v1404_v54 = vadd.f32 %v1397_v35, %v2391_v37  ;;  %v1633_v37 = vcvt.s32.f32 %v1632_v5 }
 0xed6   :  { %v1400_v46 = vmul.f32 1.442695, %v1398_v36  ;;  %v1402_v47 = vmul.f32 1.442695, %v1399_v9  ;;  %v1405_v58 = vmul.f32 1.442695, %v1404_v54  ;;  %v1634_v20 = vmul.f32 %v1633_v37, %v1633_v37 }
 0xed8   :  { %2110 = vpow2.f32 %v1400_v46  ;;  %v1636_v18 = vmul.f32 0.0044444446, %v1634_v20 }
 0xed9   :  { %2112 = vpow2.f32 %v1402_v47 }
 0xeda   :  { %2114 = vpow2.f32 %v1405_v58  ;;  %v1637_v8 = vsel %vm29_vm2, %v1636_v18, 0.0 }
 0xedb   :  { %v1638_v28 = vsel %vm79_vm3, %v1637_v8, 0.0 }
 0xee2   :  { %v2111_v3 = vpop.eup %2110 }
 0xee3   :  { %v2113_v55 = vpop.eup %2112  ;;  %v1488_v4 = vmul.f32 %v2111_v3, %v2406_v52 }
 0xee4   :  { %v1489_v57 = vmul.f32 %v2113_v55, %v2404_v45  ;;  %v2115_v2 = vpop.eup %2114  ;;  %v1588_v45 = vmul.f32 1e-06, %v1587_v15 }
 0xee6   :  { %v1490_v60 = vadd.f32 %v1489_v57, %v1488_v4 }
 0xee8   :  { %v1491_v61 = vrot.slane %v1490_v60, 4 }
 0xeea   :  { %v1492_v63 = vadd.f32 %v1491_v61, %v1490_v60 }
 0xeec   :  { %v1493_v7 = vrot.slane %v1492_v63, 2 }
 0xeee   :  { %v1494_v12 = vadd.f32 %v1493_v7, %v1492_v63 }
 0xef0   :  { %v1495_v14 = vrot.slane %v1494_v12, 1 }
 0xef2   :  { %v1496_v52 = vadd.f32 %v1495_v14, %v1494_v12 }
 0xef4   :  { %v1497_v17 = vmul.f32 %v2115_v2, %v1496_v52 }
 0xef6   :  { %v1589_v23 = vadd.f32 %v1588_v45, %v1497_v17 }
 0xef8   :  { %v1599_v25 = vsel %vm29_vm2, %v1589_v23, 0.0  ;;  %vm1590_vm11 = vcmp.ne.f32.partialorder %v1589_v23, %v1589_v23 }
 0xef9   :  { %v1600_v26 = vsel %vm79_vm3, %v1599_v25, 0.0  ;;  %vm1591_vm12 = vmand %vm1590_vm11, %vm29_vm2  ;;  %vm1649_vm2 = vcmp.eq.s32.totalorder %v2230_v13, 0 }
 0xefa   :  { %1601 = vadd.xlane.f32.xlu0 %v1600_v26  ;;  %v1592_v27 = vsel %vm1591_vm12, 1.0, %v2140_v16  ;;  %vm1654_vm3 = vmand %vm1648_vm13, %vm1653_vm15 }
 0xefb   :  { %1593 = vmax.xlane.f32.xlu1 %v1592_v27  ;;  %vm1650_vm5 = vmand %vm1648_vm13, %vm1649_vm2 }
 0xefe   :  { %1639 = vadd.xlane.f32.xlu0 %v1638_v28 }
 0xf87   :  { %v1602_v31 = vpop.xlane.xlu0 %1601 }
 0xf88   :  { %v1603_v32 = vrot.slane %v1602_v31, 4  ;;  %v1594_v33 = vpop.xlane.xlu1 %1593 }
 0xf89   :  { %1937 = vpush %v1594_v33 }
 0xf8a   :  { %v1604_v50 = vadd.f32 %v1603_v32, %v1602_v31 }
 0xf8b   :  { %v1640_v34 = vpop.xlane.xlu0 %1639 }
 0xf8c   :  { %v1605_v53 = vrot.slane %v1604_v50, 2  ;;  %v1641_v38 = vrot.slane %v1640_v34, 4 }
 0xf8e   :  { %v1642_v42 = vadd.f32 %v1641_v38, %v1640_v34  ;;  %v1606_v39 = vadd.f32 %v1605_v53, %v1604_v50 }
 0xf90   :  { %v1643_v41 = vrot.slane %v1642_v42, 2  ;;  %v1607_v21 = vrot.slane %v1606_v39, 1 }
 0xf92   :  { %v1644_v40 = vadd.f32 %v1643_v41, %v1642_v42  ;;  %v1608_v43 = vadd.f32 %v1607_v21, %v1606_v39 }
 0xf94   :  { %1939 = vpush %v1608_v43  ;;  %v1645_v16 = vrot.slane %v1644_v40, 1 }
 0xf96   :  { %v1646_v0 = vadd.f32 %v1645_v16, %v1644_v40 }
 0xf98   :  { %1941 = vpush %v1646_v0 }
 0xfba   :  { %s1938_s29 = spop %1937 }
 0xfbb   :  { %p1596_p5 = scmp.gt.f32.partialorder %s1938_s29, 0.0 }
 0xfbd   :  { %s1597_s30 = scalar_select %p1596_p5, 1, 0 }
 0xfbf   :  { %s1598_s5 = scvt.s32.f32 %s1597_s30 }
 0xfc1   :  { %v1657_v44 = vstv %s1598_s5 }
 0xfc2   :  { %v1658_v29 = vsel %vm1656_vm1, %v1657_v44, 0.0 }
 0xfc5   :  { %s1940_s6 = spop %1939 }
 0xfc6   :  { %v1661_v22 = vstv %s1940_s6 }
 0xfc9   :  { %s1942_s7 = spop %1941 }
 0xfca   :  { %v1659_v24 = vstv %s1942_s7 }
 0xfcb   :  { %v1660_v6 = vsel %vm1654_vm3, %v1659_v24, %v1658_v29 }
 0xfcc   :  { %v1662_v51 = vsel %vm1652_vm4, %v1661_v22, %v1660_v6 }
 0xfcd   :  { %v1664_v35 = vsel %vm1650_vm5, %v1663_v30, %v1662_v51 }
 0xfce   :  { %1665 = vst [vmem:[%s2448_s4] sm:$0xff] %v1664_v35 }

</bundles_post_ra>
